<compile_context>
chip_gen: v6e
topology: v6e:2x2x1
jax: 0.10.0
libtpu: 0.0.40
codegen_flags: <defaults>
</compile_context>

<pallas_src>
import jax
import jax.numpy as jnp
from jax.experimental import pallas as pl
from jax.experimental.pallas import tpu as pltpu

EPS = 1e-5
LANE = 128
VMEM_LIMIT = 32 * 1024 * 1024   # explicit; safe on v5e/v6e (128 MiB) and v7x (64 MiB)


def _round_up(x, m):
    return (x + m - 1) // m * m


# ---------------------------------------------------------------------------
# Kernel 1: 3x3 conv as a single MXU matmul per batch element + BN partials.
# ---------------------------------------------------------------------------
def _conv_stats_kernel(x_ref,       # (1, HW, K)   bf16 im2col patches (K = 9*Cin)
                       w_ref,       # (K, Cp)      bf16 folded 3x3 weights
                       y_ref,       # (1, HW, Cp)  bf16 pre-BN conv output
                       stats_ref):  # (1, 2, Cp)   f32  [sum, sum-of-squares]
    acc = jnp.dot(x_ref[0], w_ref[...],
                  preferred_element_type=jnp.float32)            # (HW, Cp) f32
    y_ref[0] = acc.astype(y_ref.dtype)
    s1 = jnp.sum(acc, axis=0, keepdims=True)                     # (1, Cp)
    s2 = jnp.sum(acc * acc, axis=0, keepdims=True)               # (1, Cp)
    stats_ref[0] = jnp.concatenate([s1, s2], axis=0)             # (2, Cp)


# ---------------------------------------------------------------------------
# Kernel 2: fused (y * scale + shift) -> ReLU -> store only the real Cout
# lanes (BN affine + batch stats pre-folded into scale/shift by the wrapper).
# ---------------------------------------------------------------------------
def _bn_relu_kernel(y_ref,       # (1, HW, Cp)   bf16
                    scale_ref,   # (1, Cp)       f32
                    shift_ref,   # (1, Cp)       f32
                    o_ref):      # (1, HW, Cout) out dtype  (Cout < Cp)
    cout = o_ref.shape[-1]
    y = y_ref[0].astype(jnp.float32)                             # (HW, Cp)
    act = jnp.maximum(y * scale_ref[...] + shift_ref[...], 0.0)  # (HW, Cp)
    o_ref[0] = act[:, :cout].astype(o_ref.dtype)                 # masked store


# ---------------------------------------------------------------------------
# Wrapper-side layout helpers (pure XLA data movement).
# ---------------------------------------------------------------------------
def _im2col_3x3(x_nhwc, dtype):
    """(N,H,W,C) -> (N, H*W, 9*C): 9 shifted taps concatenated on the lane dim
    (dy-major, then dx, then channel), built directly in the bf16 compute
    dtype and pre-flattened so the kernel needs no in-kernel reshape."""
    n, h, w, c = x_nhwc.shape
    xp = jnp.pad(x_nhwc.astype(dtype), ((0, 0), (1, 1), (1, 1), (0, 0)))
    taps = [xp[:, dy:dy + h, dx:dx + w, :] for dy in range(3) for dx in range(3)]
    cat = jnp.concatenate(taps, axis=-1)                          # (N,H,W,9C)
    return cat.reshape(n, h * w, 9 * c)


def _fold_weight(w_hwio, cp, dtype):
    """(3,3,Cin,Cout) -> (9*Cin, Cp) matching the im2col tap/channel order;
    only the output-channel dim is padded (to a lane-dense 128)."""
    kh, kw, cin, cout = w_hwio.shape
    wm = w_hwio.reshape(kh * kw * cin, cout)
    wm = jnp.pad(wm, ((0, 0), (0, cp - cout)))
    return wm.astype(dtype)


def _conv_bn_relu(x_nhwc, w_hwio, gamma, beta, *, out_dtype,
                  compute_dtype=jnp.bfloat16):
    """One (conv3x3 -> train-mode BN -> ReLU) stage. Returns (N,H,W,Cout)."""
    n, h, w, cin = x_nhwc.shape
    cout = w_hwio.shape[-1]
    hw = h * w
    k = 9 * cin                         # un-padded im2col depth (<= 128 here)
    cp = _round_up(cout, LANE)          # lane-dense conv-output / MXU N dim

    x_cols = _im2col_3x3(x_nhwc, compute_dtype)                  # (N,HW,K)
    w_mat = _fold_weight(w_hwio, cp, compute_dtype)              # (K,Cp)

    y, stats = pl.pallas_call(
        _conv_stats_kernel,
        grid=(n,),
        in_specs=[
            pl.BlockSpec((1, hw, k), lambda b: (b, 0, 0)),
            pl.BlockSpec((k, cp), lambda b: (0, 0)),
        ],
        out_specs=(
            pl.BlockSpec((1, hw, cp), lambda b: (b, 0, 0)),
            pl.BlockSpec((1, 2, cp), lambda b: (b, 0, 0)),
        ),
        out_shape=(
            jax.ShapeDtypeStruct((n, hw, cp), jnp.bfloat16),     # y in bf16
            jax.ShapeDtypeStruct((n, 2, cp), jnp.float32),       # f32 partials
        ),
        compiler_params=pltpu.CompilerParams(
            dimension_semantics=("parallel",),
            vmem_limit_bytes=VMEM_LIMIT),
    )(x_cols, w_mat)

    # Tiny per-channel reduction of the per-batch partials; fold gamma/beta.
    # (E[x^2]-E[x]^2 in f32 is fine at this scale; clamp guards tiny negatives.)
    count = n * hw
    total = jnp.sum(stats, axis=0)                               # (2, Cp)
    mean = total[0] / count
    var = jnp.maximum(total[1] / count - mean * mean, 0.0)       # biased batch var
    gamma_p = jnp.pad(gamma, (0, cp - cout))
    beta_p = jnp.pad(beta, (0, cp - cout))
    scale = (gamma_p * jax.lax.rsqrt(var + EPS)).reshape(1, cp).astype(jnp.float32)
    shift = (beta_p - mean * gamma_p * jax.lax.rsqrt(var + EPS)
             ).reshape(1, cp).astype(jnp.float32)

    a = pl.pallas_call(
        _bn_relu_kernel,
        grid=(n,),
        in_specs=[
            pl.BlockSpec((1, hw, cp), lambda b: (b, 0, 0)),
            pl.BlockSpec((1, cp), lambda b: (0, 0)),
            pl.BlockSpec((1, cp), lambda b: (0, 0)),
        ],
        out_specs=pl.BlockSpec((1, hw, cout), lambda b: (b, 0, 0)),
        out_shape=jax.ShapeDtypeStruct((n, hw, cout), out_dtype),
        compiler_params=pltpu.CompilerParams(
            dimension_semantics=("parallel",),
            vmem_limit_bytes=VMEM_LIMIT),
    )(y, scale, shift)

    return a.reshape(n, h, w, cout)


def double_conv(x_nchw, params):
    """x_nchw: (N, Cin, H, W) f32 -> (N, Cout, H, W) f32 (training-mode BN).
    Conv biases in `params` are ignored by the kernels because train-mode BN's
    mean subtraction cancels them exactly (numerically identical output)."""
    w1, _b1, g1, be1, w2, _b2, g2, be2 = params
    x_nhwc = jnp.transpose(x_nchw, (0, 2, 3, 1))
    a1 = _conv_bn_relu(x_nhwc, w1, g1, be1, out_dtype=jnp.bfloat16)
    a2 = _conv_bn_relu(a1, w2, g2, be2, out_dtype=jnp.float32)
    return jnp.transpose(a2, (0, 3, 1, 2))


# ---------------------------------------------------------------------------
# Pure-JAX reference (training-mode DoubleConv). Conv operands are cast to the
# same bf16 compute dtype the kernel feeds the MXU so the numerical comparison
# is apples-to-apples; accumulation and BN math are f32.
# ---------------------------------------------------------------------------
def ref_double_conv(x_nchw, params, compute_dtype=jnp.bfloat16):
    w1, b1, g1, be1, w2, b2, g2, be2 = params
    x = jnp.transpose(x_nchw, (0, 2, 3, 1))

    def conv(x, w, b):
        y = jax.lax.conv_general_dilated(
            x.astype(compute_dtype), w.astype(compute_dtype),
            window_strides=(1, 1), padding="SAME",
            dimension_numbers=("NHWC", "HWIO", "NHWC"),
            preferred_element_type=jnp.float32)
        return y + b

    def bn_relu(y, g, be):
        mean = jnp.mean(y, axis=(0, 1, 2), keepdims=True)
        var = jnp.mean((y - mean) ** 2, axis=(0, 1, 2), keepdims=True)
        return jnp.maximum((y - mean) * jax.lax.rsqrt(var + EPS) * g + be, 0.0)

    a1 = bn_relu(conv(x, w1, b1), g1, be1)
    a2 = bn_relu(conv(a1, w2, b2), g2, be2)
    return jnp.transpose(a2, (0, 3, 1, 2))


def make_params(key, in_channels, out_channels, mid_channels=None):
    if not mid_channels:
        mid_channels = out_channels
    ks = jax.random.split(key, 8)
    w1 = 0.1 * jax.random.normal(ks[0], (3, 3, in_channels, mid_channels), jnp.float32)
    b1 = 0.1 * jax.random.normal(ks[1], (mid_channels,), jnp.float32)
    g1 = 1.0 + 0.1 * jax.random.normal(ks[2], (mid_channels,), jnp.float32)
    be1 = 0.1 * jax.random.normal(ks[3], (mid_channels,), jnp.float32)
    w2 = 0.1 * jax.random.normal(ks[4], (3, 3, mid_channels, out_channels), jnp.float32)
    b2 = 0.1 * jax.random.normal(ks[5], (out_channels,), jnp.float32)
    g2 = 1.0 + 0.1 * jax.random.normal(ks[6], (out_channels,), jnp.float32)
    be2 = 0.1 * jax.random.normal(ks[7], (out_channels,), jnp.float32)
    return (w1, b1, g1, be1, w2, b2, g2, be2)


if __name__ == "__main__":
    key = jax.random.PRNGKey(0)
    k_x, k_p = jax.random.split(key)

    N, Cin, H, W = 2, 4, 16, 16
    Cout = 8
    x = jax.random.normal(k_x, (N, Cin, H, W), jnp.float32)   # NCHW, like PyTorch
    params = make_params(k_p, Cin, Cout)

    out = jax.block_until_ready(jax.jit(double_conv)(x, params))
    ref = jax.block_until_ready(jax.jit(ref_double_conv)(x, params))

    assert out.shape == (N, Cout, H, W)
    # Tolerance accounts for bf16 MXU operands, the bf16 inter-stage activation
    # AND the bf16-stored pre-BN intermediate y (per the perf feedback); all
    # accumulation and BN statistics remain f32.
    err = float(jnp.max(jnp.abs(out - ref)))
    assert jnp.allclose(out, ref, rtol=5e-2, atol=5e-2), f"max abs err {err}"
    print("KERNEL_OK")
</pallas_src>

<mosaic_0001>
module attributes {stable_mosaic.version = 11 : i64} {
  func.func @_bn_relu_kernel(%arg0: i32, %arg1: memref<1x256x128xbf16, #tpu.memory_space<vmem>>, %arg2: memref<1x128xf32, #tpu.memory_space<vmem>>, %arg3: memref<1x128xf32, #tpu.memory_space<vmem>>, %arg4: memref<1x256x8xbf16, #tpu.memory_space<vmem>>) attributes {dimension_semantics = [#tpu.dimension_semantics<parallel>], iteration_bounds = array<i64: 2>, scalar_prefetch = 0 : i64, scratch_operands = 0 : i64, tpu.core_type = #tpu.core_type<tc>, window_params = [{transform_indices = @transform_0, window_bounds = array<i64: 1, 256, 128>}, {pipeline_mode = #tpu.pipeline_mode<synchronous>, transform_indices = @transform_1, window_bounds = array<i64: 1, 128>}, {pipeline_mode = #tpu.pipeline_mode<synchronous>, transform_indices = @transform_2, window_bounds = array<i64: 1, 128>}, {transform_indices = @transform_3, window_bounds = array<i64: 1, 256, 8>}]} {
    %c0 = arith.constant 0 : index
    %c0_0 = arith.constant 0 : index
    %c0_1 = arith.constant 0 : index
    %0 = vector.load %arg1[%c0, %c0_0, %c0_1] : memref<1x256x128xbf16, #tpu.memory_space<vmem>>, vector<1x256x128xbf16>
    %1 = vector.shape_cast %0 : vector<1x256x128xbf16> to vector<256x128xbf16>
    %2 = arith.extf %1 : vector<256x128xbf16> to vector<256x128xf32>
    %c0_2 = arith.constant 0 : index
    %c0_3 = arith.constant 0 : index
    %3 = vector.load %arg2[%c0_2, %c0_3] : memref<1x128xf32, #tpu.memory_space<vmem>>, vector<1x128xf32>
    %4 = vector.broadcast %3 : vector<1x128xf32> to vector<256x128xf32>
    %5 = arith.mulf %2, %4 : vector<256x128xf32>
    %c0_4 = arith.constant 0 : index
    %c0_5 = arith.constant 0 : index
    %6 = vector.load %arg3[%c0_4, %c0_5] : memref<1x128xf32, #tpu.memory_space<vmem>>, vector<1x128xf32>
    %7 = vector.broadcast %6 : vector<1x128xf32> to vector<256x128xf32>
    %8 = arith.addf %5, %7 : vector<256x128xf32>
    %cst = arith.constant 0.000000e+00 : f32
    %9 = vector.broadcast %cst : f32 to vector<256x128xf32>
    %10 = arith.maximumf %8, %9 : vector<256x128xf32>
    %11 = vector.extract_strided_slice %10 {offsets = [0, 0], sizes = [256, 8], strides = [1, 1]} : vector<256x128xf32> to vector<256x8xf32>
    %12 = arith.truncf %11 : vector<256x8xf32> to vector<256x8xbf16>
    %c0_6 = arith.constant 0 : index
    %c0_7 = arith.constant 0 : index
    %c0_8 = arith.constant 0 : index
    %13 = vector.load %arg4[%c0_6, %c0_7, %c0_8] : memref<1x256x8xbf16, #tpu.memory_space<vmem>>, vector<1x256x8xbf16>
    %14 = vector.shape_cast %13 : vector<1x256x8xbf16> to vector<256x8xbf16>
    %15 = vector.shape_cast %12 : vector<256x8xbf16> to vector<1x256x8xbf16>
    tpu.vector_store %arg4[%c0_6, %c0_7, %c0_8], %15 {strides = array<i32>} : memref<1x256x8xbf16, #tpu.memory_space<vmem>>, vector<1x256x8xbf16>,
    return
  }
  func.func @transform_0(%arg0: i32) -> (i32, i32, i32) {
    %c0_i32 = arith.constant 0 : i32
    %c0_i32_0 = arith.constant 0 : i32
    %c0_i32_1 = arith.constant 0 : i32
    return %arg0, %c0_i32, %c0_i32_0 : i32, i32, i32
  }
  func.func @transform_1(%arg0: i32) -> (i32, i32) {
    %c0_i32 = arith.constant 0 : i32
    %c0_i32_0 = arith.constant 0 : i32
    %c0_i32_1 = arith.constant 0 : i32
    return %c0_i32, %c0_i32_0 : i32, i32
  }
  func.func @transform_2(%arg0: i32) -> (i32, i32) {
    %c0_i32 = arith.constant 0 : i32
    %c0_i32_0 = arith.constant 0 : i32
    %c0_i32_1 = arith.constant 0 : i32
    return %c0_i32, %c0_i32_0 : i32, i32
  }
  func.func @transform_3(%arg0: i32) -> (i32, i32, i32) {
    %c0_i32 = arith.constant 0 : i32
    %c0_i32_0 = arith.constant 0 : i32
    %c0_i32_1 = arith.constant 0 : i32
    return %arg0, %c0_i32, %c0_i32_0 : i32, i32, i32
  }
}

module attributes {stable_mosaic.version = 11 : i64} {
  func.func @_conv_stats_kernel(%arg0: i32, %arg1: memref<1x256x36xbf16, #tpu.memory_space<vmem>>, %arg2: memref<36x128xbf16, #tpu.memory_space<vmem>>, %arg3: memref<1x256x128xbf16, #tpu.memory_space<vmem>>, %arg4: memref<1x2x128xf32, #tpu.memory_space<vmem>>) attributes {dimension_semantics = [#tpu.dimension_semantics<parallel>], iteration_bounds = array<i64: 2>, scalar_prefetch = 0 : i64, scratch_operands = 0 : i64, tpu.core_type = #tpu.core_type<tc>, window_params = [{transform_indices = @transform_0, window_bounds = array<i64: 1, 256, 36>}, {pipeline_mode = #tpu.pipeline_mode<synchronous>, transform_indices = @transform_1, window_bounds = array<i64: 36, 128>}, {transform_indices = @transform_2, window_bounds = array<i64: 1, 256, 128>}, {transform_indices = @transform_3, window_bounds = array<i64: 1, 2, 128>}]} {
    %c0 = arith.constant 0 : index
    %c0_0 = arith.constant 0 : index
    %c0_1 = arith.constant 0 : index
    %0 = vector.load %arg1[%c0, %c0_0, %c0_1] : memref<1x256x36xbf16, #tpu.memory_space<vmem>>, vector<1x256x36xbf16>
    %1 = vector.shape_cast %0 : vector<1x256x36xbf16> to vector<256x36xbf16>
    %c0_2 = arith.constant 0 : index
    %c0_3 = arith.constant 0 : index
    %2 = vector.load %arg2[%c0_2, %c0_3] : memref<36x128xbf16, #tpu.memory_space<vmem>>, vector<36x128xbf16>
    %cst = arith.constant dense<0.000000e+00> : vector<256x128xf32>
    %3 = tpu.matmul %1, %2, %cst {dimension_numbers = #tpu.dot_dimension_numbers<[1], [0], [0], [1], [0, 0, 1, 1], [], []>} : vector<256x36xbf16>, vector<36x128xbf16>, vector<256x128xf32> -> vector<256x128xf32>
    %4 = arith.truncf %3 : vector<256x128xf32> to vector<256x128xbf16>
    %c0_4 = arith.constant 0 : index
    %c0_5 = arith.constant 0 : index
    %c0_6 = arith.constant 0 : index
    %5 = vector.load %arg3[%c0_4, %c0_5, %c0_6] : memref<1x256x128xbf16, #tpu.memory_space<vmem>>, vector<1x256x128xbf16>
    %6 = vector.shape_cast %5 : vector<1x256x128xbf16> to vector<256x128xbf16>
    %7 = vector.shape_cast %4 : vector<256x128xbf16> to vector<1x256x128xbf16>
    tpu.vector_store %arg3[%c0_4, %c0_5, %c0_6], %7 {strides = array<i32>} : memref<1x256x128xbf16, #tpu.memory_space<vmem>>, vector<1x256x128xbf16>,
    %cst_7 = arith.constant dense<0.000000e+00> : vector<128xf32>
    %8 = vector.multi_reduction <add>, %3, %cst_7 [0] : vector<256x128xf32> to vector<128xf32>
    %9 = vector.shape_cast %8 : vector<128xf32> to vector<1x128xf32>
    %10 = arith.mulf %3, %3 : vector<256x128xf32>
    %cst_8 = arith.constant dense<0.000000e+00> : vector<128xf32>
    %11 = vector.multi_reduction <add>, %10, %cst_8 [0] : vector<256x128xf32> to vector<128xf32>
    %12 = vector.shape_cast %11 : vector<128xf32> to vector<1x128xf32>
    %13 = tpu.concatenate %9, %12 in 0 : vector<1x128xf32>, vector<1x128xf32> -> vector<2x128xf32>
    %c0_9 = arith.constant 0 : index
    %c0_10 = arith.constant 0 : index
    %c0_11 = arith.constant 0 : index
    %14 = vector.load %arg4[%c0_9, %c0_10, %c0_11] : memref<1x2x128xf32, #tpu.memory_space<vmem>>, vector<1x2x128xf32>
    %15 = vector.shape_cast %14 : vector<1x2x128xf32> to vector<2x128xf32>
    %16 = vector.shape_cast %13 : vector<2x128xf32> to vector<1x2x128xf32>
    tpu.vector_store %arg4[%c0_9, %c0_10, %c0_11], %16 {strides = array<i32>} : memref<1x2x128xf32, #tpu.memory_space<vmem>>, vector<1x2x128xf32>,
    return
  }
  func.func @transform_0(%arg0: i32) -> (i32, i32, i32) {
    %c0_i32 = arith.constant 0 : i32
    %c0_i32_0 = arith.constant 0 : i32
    %c0_i32_1 = arith.constant 0 : i32
    return %arg0, %c0_i32, %c0_i32_0 : i32, i32, i32
  }
  func.func @transform_1(%arg0: i32) -> (i32, i32) {
    %c0_i32 = arith.constant 0 : i32
    %c0_i32_0 = arith.constant 0 : i32
    %c0_i32_1 = arith.constant 0 : i32
    return %c0_i32, %c0_i32_0 : i32, i32
  }
  func.func @transform_2(%arg0: i32) -> (i32, i32, i32) {
    %c0_i32 = arith.constant 0 : i32
    %c0_i32_0 = arith.constant 0 : i32
    %c0_i32_1 = arith.constant 0 : i32
    return %arg0, %c0_i32, %c0_i32_0 : i32, i32, i32
  }
  func.func @transform_3(%arg0: i32) -> (i32, i32, i32) {
    %c0_i32 = arith.constant 0 : i32
    %c0_i32_0 = arith.constant 0 : i32
    %c0_i32_1 = arith.constant 0 : i32
    return %arg0, %c0_i32, %c0_i32_0 : i32, i32, i32
  }
}

module attributes {stable_mosaic.version = 11 : i64} {
  func.func @_conv_stats_kernel(%arg0: i32, %arg1: memref<1x256x72xbf16, #tpu.memory_space<vmem>>, %arg2: memref<72x128xbf16, #tpu.memory_space<vmem>>, %arg3: memref<1x256x128xbf16, #tpu.memory_space<vmem>>, %arg4: memref<1x2x128xf32, #tpu.memory_space<vmem>>) attributes {dimension_semantics = [#tpu.dimension_semantics<parallel>], iteration_bounds = array<i64: 2>, scalar_prefetch = 0 : i64, scratch_operands = 0 : i64, tpu.core_type = #tpu.core_type<tc>, window_params = [{transform_indices = @transform_0, window_bounds = array<i64: 1, 256, 72>}, {pipeline_mode = #tpu.pipeline_mode<synchronous>, transform_indices = @transform_1, window_bounds = array<i64: 72, 128>}, {transform_indices = @transform_2, window_bounds = array<i64: 1, 256, 128>}, {transform_indices = @transform_3, window_bounds = array<i64: 1, 2, 128>}]} {
    %c0 = arith.constant 0 : index
    %c0_0 = arith.constant 0 : index
    %c0_1 = arith.constant 0 : index
    %0 = vector.load %arg1[%c0, %c0_0, %c0_1] : memref<1x256x72xbf16, #tpu.memory_space<vmem>>, vector<1x256x72xbf16>
    %1 = vector.shape_cast %0 : vector<1x256x72xbf16> to vector<256x72xbf16>
    %c0_2 = arith.constant 0 : index
    %c0_3 = arith.constant 0 : index
    %2 = vector.load %arg2[%c0_2, %c0_3] : memref<72x128xbf16, #tpu.memory_space<vmem>>, vector<72x128xbf16>
    %cst = arith.constant dense<0.000000e+00> : vector<256x128xf32>
    %3 = tpu.matmul %1, %2, %cst {dimension_numbers = #tpu.dot_dimension_numbers<[1], [0], [0], [1], [0, 0, 1, 1], [], []>} : vector<256x72xbf16>, vector<72x128xbf16>, vector<256x128xf32> -> vector<256x128xf32>
    %4 = arith.truncf %3 : vector<256x128xf32> to vector<256x128xbf16>
    %c0_4 = arith.constant 0 : index
    %c0_5 = arith.constant 0 : index
    %c0_6 = arith.constant 0 : index
    %5 = vector.load %arg3[%c0_4, %c0_5, %c0_6] : memref<1x256x128xbf16, #tpu.memory_space<vmem>>, vector<1x256x128xbf16>
    %6 = vector.shape_cast %5 : vector<1x256x128xbf16> to vector<256x128xbf16>
    %7 = vector.shape_cast %4 : vector<256x128xbf16> to vector<1x256x128xbf16>
    tpu.vector_store %arg3[%c0_4, %c0_5, %c0_6], %7 {strides = array<i32>} : memref<1x256x128xbf16, #tpu.memory_space<vmem>>, vector<1x256x128xbf16>,
    %cst_7 = arith.constant dense<0.000000e+00> : vector<128xf32>
    %8 = vector.multi_reduction <add>, %3, %cst_7 [0] : vector<256x128xf32> to vector<128xf32>
    %9 = vector.shape_cast %8 : vector<128xf32> to vector<1x128xf32>
    %10 = arith.mulf %3, %3 : vector<256x128xf32>
    %cst_8 = arith.constant dense<0.000000e+00> : vector<128xf32>
    %11 = vector.multi_reduction <add>, %10, %cst_8 [0] : vector<256x128xf32> to vector<128xf32>
    %12 = vector.shape_cast %11 : vector<128xf32> to vector<1x128xf32>
    %13 = tpu.concatenate %9, %12 in 0 : vector<1x128xf32>, vector<1x128xf32> -> vector<2x128xf32>
    %c0_9 = arith.constant 0 : index
    %c0_10 = arith.constant 0 : index
    %c0_11 = arith.constant 0 : index
    %14 = vector.load %arg4[%c0_9, %c0_10, %c0_11] : memref<1x2x128xf32, #tpu.memory_space<vmem>>, vector<1x2x128xf32>
    %15 = vector.shape_cast %14 : vector<1x2x128xf32> to vector<2x128xf32>
    %16 = vector.shape_cast %13 : vector<2x128xf32> to vector<1x2x128xf32>
    tpu.vector_store %arg4[%c0_9, %c0_10, %c0_11], %16 {strides = array<i32>} : memref<1x2x128xf32, #tpu.memory_space<vmem>>, vector<1x2x128xf32>,
    return
  }
  func.func @transform_0(%arg0: i32) -> (i32, i32, i32) {
    %c0_i32 = arith.constant 0 : i32
    %c0_i32_0 = arith.constant 0 : i32
    %c0_i32_1 = arith.constant 0 : i32
    return %arg0, %c0_i32, %c0_i32_0 : i32, i32, i32
  }
  func.func @transform_1(%arg0: i32) -> (i32, i32) {
    %c0_i32 = arith.constant 0 : i32
    %c0_i32_0 = arith.constant 0 : i32
    %c0_i32_1 = arith.constant 0 : i32
    return %c0_i32, %c0_i32_0 : i32, i32
  }
  func.func @transform_2(%arg0: i32) -> (i32, i32, i32) {
    %c0_i32 = arith.constant 0 : i32
    %c0_i32_0 = arith.constant 0 : i32
    %c0_i32_1 = arith.constant 0 : i32
    return %arg0, %c0_i32, %c0_i32_0 : i32, i32, i32
  }
  func.func @transform_3(%arg0: i32) -> (i32, i32, i32) {
    %c0_i32 = arith.constant 0 : i32
    %c0_i32_0 = arith.constant 0 : i32
    %c0_i32_1 = arith.constant 0 : i32
    return %arg0, %c0_i32, %c0_i32_0 : i32, i32, i32
  }
}

module attributes {stable_mosaic.version = 11 : i64} {
  func.func @_bn_relu_kernel(%arg0: i32, %arg1: memref<1x256x128xbf16, #tpu.memory_space<vmem>>, %arg2: memref<1x128xf32, #tpu.memory_space<vmem>>, %arg3: memref<1x128xf32, #tpu.memory_space<vmem>>, %arg4: memref<1x256x8xf32, #tpu.memory_space<vmem>>) attributes {dimension_semantics = [#tpu.dimension_semantics<parallel>], iteration_bounds = array<i64: 2>, scalar_prefetch = 0 : i64, scratch_operands = 0 : i64, tpu.core_type = #tpu.core_type<tc>, window_params = [{transform_indices = @transform_0, window_bounds = array<i64: 1, 256, 128>}, {pipeline_mode = #tpu.pipeline_mode<synchronous>, transform_indices = @transform_1, window_bounds = array<i64: 1, 128>}, {pipeline_mode = #tpu.pipeline_mode<synchronous>, transform_indices = @transform_2, window_bounds = array<i64: 1, 128>}, {transform_indices = @transform_3, window_bounds = array<i64: 1, 256, 8>}]} {
    %c0 = arith.constant 0 : index
    %c0_0 = arith.constant 0 : index
    %c0_1 = arith.constant 0 : index
    %0 = vector.load %arg1[%c0, %c0_0, %c0_1] : memref<1x256x128xbf16, #tpu.memory_space<vmem>>, vector<1x256x128xbf16>
    %1 = vector.shape_cast %0 : vector<1x256x128xbf16> to vector<256x128xbf16>
    %2 = arith.extf %1 : vector<256x128xbf16> to vector<256x128xf32>
    %c0_2 = arith.constant 0 : index
    %c0_3 = arith.constant 0 : index
    %3 = vector.load %arg2[%c0_2, %c0_3] : memref<1x128xf32, #tpu.memory_space<vmem>>, vector<1x128xf32>
    %4 = vector.broadcast %3 : vector<1x128xf32> to vector<256x128xf32>
    %5 = arith.mulf %2, %4 : vector<256x128xf32>
    %c0_4 = arith.constant 0 : index
    %c0_5 = arith.constant 0 : index
    %6 = vector.load %arg3[%c0_4, %c0_5] : memref<1x128xf32, #tpu.memory_space<vmem>>, vector<1x128xf32>
    %7 = vector.broadcast %6 : vector<1x128xf32> to vector<256x128xf32>
    %8 = arith.addf %5, %7 : vector<256x128xf32>
    %cst = arith.constant 0.000000e+00 : f32
    %9 = vector.broadcast %cst : f32 to vector<256x128xf32>
    %10 = arith.maximumf %8, %9 : vector<256x128xf32>
    %11 = vector.extract_strided_slice %10 {offsets = [0, 0], sizes = [256, 8], strides = [1, 1]} : vector<256x128xf32> to vector<256x8xf32>
    %c0_6 = arith.constant 0 : index
    %c0_7 = arith.constant 0 : index
    %c0_8 = arith.constant 0 : index
    %12 = vector.load %arg4[%c0_6, %c0_7, %c0_8] : memref<1x256x8xf32, #tpu.memory_space<vmem>>, vector<1x256x8xf32>
    %13 = vector.shape_cast %12 : vector<1x256x8xf32> to vector<256x8xf32>
    %14 = vector.shape_cast %11 : vector<256x8xf32> to vector<1x256x8xf32>
    tpu.vector_store %arg4[%c0_6, %c0_7, %c0_8], %14 {strides = array<i32>} : memref<1x256x8xf32, #tpu.memory_space<vmem>>, vector<1x256x8xf32>,
    return
  }
  func.func @transform_0(%arg0: i32) -> (i32, i32, i32) {
    %c0_i32 = arith.constant 0 : i32
    %c0_i32_0 = arith.constant 0 : i32
    %c0_i32_1 = arith.constant 0 : i32
    return %arg0, %c0_i32, %c0_i32_0 : i32, i32, i32
  }
  func.func @transform_1(%arg0: i32) -> (i32, i32) {
    %c0_i32 = arith.constant 0 : i32
    %c0_i32_0 = arith.constant 0 : i32
    %c0_i32_1 = arith.constant 0 : i32
    return %c0_i32, %c0_i32_0 : i32, i32
  }
  func.func @transform_2(%arg0: i32) -> (i32, i32) {
    %c0_i32 = arith.constant 0 : i32
    %c0_i32_0 = arith.constant 0 : i32
    %c0_i32_1 = arith.constant 0 : i32
    return %c0_i32, %c0_i32_0 : i32, i32
  }
  func.func @transform_3(%arg0: i32) -> (i32, i32, i32) {
    %c0_i32 = arith.constant 0 : i32
    %c0_i32_0 = arith.constant 0 : i32
    %c0_i32_1 = arith.constant 0 : i32
    return %arg0, %c0_i32, %c0_i32_0 : i32, i32, i32
  }
}

</mosaic_0001>

<bundles_post_ra>
// kernel: double_conv.5
= control target key start
LH: loop header
LB: loop body
LE: loop exit
PB: predicated region body
PF: predicated region fallthrough
CT: control target
= control target key end

     0   :  { %s755_s12 = smov 0   ;;  %s937_s0 = inlined_call_operand.vmem [shape: bf16[2,256,128], index: 0, kind: input, shape index: {}]   ;;  %s938_s1 = inlined_call_operand.vmem [shape: f32[1,128], index: 1, kind: input, shape index: {}]   ;;  %s939_s2 = inlined_call_operand.vmem [shape: f32[1,128], index: 2, kind: input, shape index: {}]   ;;  %s940_s3 = inlined_call_operand.vmem [shape: bf16[2,256,8], index: 3, kind: output, shape index: {}]  }
   0x1 LB: > { %s561_s13 = sadd.s32 4294967295, %s733_s12   ;;  %p565_p0 = scmp.ge.s32.totalorder %s733_s12, 1  ;;  %s733_s12 = sphi %s755_s12, %s13_s12  }
   0x2   : > { %p137_p1 = scmp.lt.s32.totalorder %s733_s12, 3 }
   0x4   : > { %p138_p2 = pnand %p565_p0, %p137_p1 }
   0x5   : > { %p161_p3 = scmp.lt.s32.totalorder (!%p138_p2), %s561_s13, 1 }
   0x6   : > { %141 = sbr.rel (%p138_p2) target bundleno = 59 (0x3b), region = 32 }
   0xb   : > { %s942_s13 = smov (!%p161_p3, %s561_s13), 1  ;;  %v776_v0 = vld [vmem:[%s938_s1] ss:$0 sm:$0xff]  ;;  %vm473_vm0 = vcmask 60416  }
   0xc   : > { %s606_s14 = sshll.u32 %s942_s13, 7  ;;  %v785_v9 = vld [vmem:[%s939_s2] ss:$0 sm:$0xff] }
   0xd   : > { %s771_s17 = scalar_lea.vmem %s937_s0, %s606_s14  ;;  %s808_s24 = scalar_lea.vmem %s940_s3, %s606_s14 }
   0xe   : > { %v641_v1 = vld [vmem:[%s771_s17] sm:$0xff]   ;;  %v704_v2 = vld [vmem:[%s771_s17 + $0x8] sm:$0xff]   ;;  %v705_v3 = vld [vmem:[%s771_s17 + $0x10] sm:$0xff]  }
   0xf   : > { %v642_v4 = vunpack.c.l.bf16 %v641_v1  ;;  %v643_v5 = vunpack.c.h.bf16 %v641_v1  ;;  %v646_v6 = vunpack.c.l.bf16 %v704_v2  ;;  %v647_v7 = vunpack.c.h.bf16 %v704_v2  ;;  %v706_v8 = vld [vmem:[%s771_s17 + $0x18] sm:$0xff]   ;;  %v707_v38 = vld [vmem:[%s771_s17 + $0x20] sm:$0xff]   ;;  %v708_v39 = vld [vmem:[%s771_s17 + $0x28] sm:$0xff]  }
  0x10   : > { %v650_v10 = vunpack.c.l.bf16 %v705_v3  ;;  %v651_v11 = vunpack.c.h.bf16 %v705_v3  ;;  %v654_v12 = vunpack.c.l.bf16 %v706_v8  ;;  %v655_v13 = vunpack.c.h.bf16 %v706_v8  ;;  %v709_v44 = vld [vmem:[%s771_s17 + $0x30] sm:$0xff]   ;;  %v710_v45 = vld [vmem:[%s771_s17 + $0x38] sm:$0xff]  }
  0x11   : > { %v242_v14 = vmul.f32 %v642_v4, %v776_v0  ;;  %v243_v15 = vmul.f32 %v643_v5, %v776_v0  ;;  %v244_v16 = vmul.f32 %v646_v6, %v776_v0  ;;  %v245_v17 = vmul.f32 %v647_v7, %v776_v0 }
  0x12   : > { %v246_v18 = vmul.f32 %v650_v10, %v776_v0  ;;  %v247_v19 = vmul.f32 %v651_v11, %v776_v0  ;;  %v248_v20 = vmul.f32 %v654_v12, %v776_v0  ;;  %v249_v21 = vmul.f32 %v655_v13, %v776_v0 }
  0x13   : > { %v281_v22 = vadd.f32 %v785_v9, %v242_v14  ;;  %v282_v23 = vadd.f32 %v785_v9, %v243_v15  ;;  %v283_v24 = vadd.f32 %v785_v9, %v244_v16  ;;  %v284_v25 = vadd.f32 %v785_v9, %v245_v17 }
  0x14   : > { %v285_v26 = vadd.f32 %v785_v9, %v246_v18  ;;  %v286_v27 = vadd.f32 %v785_v9, %v247_v19  ;;  %v287_v28 = vadd.f32 %v785_v9, %v248_v20  ;;  %v288_v29 = vadd.f32 %v785_v9, %v249_v21  ;;  %v711_v20 = vld [vmem:[%s771_s17 + $0x40] sm:$0xff]   ;;  %v712_v21 = vld [vmem:[%s771_s17 + $0x48] sm:$0xff]  }
  0x15   : > { %v313_v30 = vmax.f32 %v281_v22, 0.0  ;;  %v314_v31 = vmax.f32 %v282_v23, 0.0  ;;  %v315_v32 = vmax.f32 %v283_v24, 0.0  ;;  %v316_v33 = vmax.f32 %v284_v25, 0.0 }
  0x16   : > { %v317_v34 = vmax.f32 %v285_v26, 0.0  ;;  %v318_v35 = vmax.f32 %v286_v27, 0.0  ;;  %v319_v36 = vmax.f32 %v287_v28, 0.0  ;;  %v320_v37 = vmax.f32 %v288_v29, 0.0  ;;  %v713_v26 = vld [vmem:[%s771_s17 + $0x50] sm:$0xff]   ;;  %v714_v27 = vld [vmem:[%s771_s17 + $0x58] sm:$0xff]  }
  0x17   : > { %v608_v40 = vpack.c.bf16 %v313_v30, %v313_v30  ;;  %v609_v41 = vpack.c.bf16 %v314_v31, %v314_v31  ;;  %v610_v42 = vpack.c.bf16 %v315_v32, %v315_v32  ;;  %v611_v43 = vpack.c.bf16 %v316_v33, %v316_v33 }
  0x18   : > { %v612_v46 = vpack.c.bf16 %v317_v34, %v317_v34  ;;  %v613_v47 = vpack.c.bf16 %v318_v35, %v318_v35  ;;  %v614_v48 = vpack.c.bf16 %v319_v36, %v319_v36  ;;  %v615_v49 = vpack.c.bf16 %v320_v37, %v320_v37 }
  0x19   : > { %474 = vst.msk [vmem:[%s808_s24] sm:$0xf] %vm473_vm0, %v608_v40  ;;  %475 = vst.msk [vmem:[%s808_s24 + $0x4] sm:$0xf] %vm473_vm0, %v609_v41  ;;  %v658_v50 = vunpack.c.l.bf16 %v707_v38  ;;  %v659_v51 = vunpack.c.h.bf16 %v707_v38  ;;  %v662_v52 = vunpack.c.l.bf16 %v708_v39  ;;  %v663_v53 = vunpack.c.h.bf16 %v708_v39 }
  0x1a   : > { %476 = vst.msk [vmem:[%s808_s24 + $0x8] sm:$0xf] %vm473_vm0, %v610_v42  ;;  %477 = vst.msk [vmem:[%s808_s24 + $0xc] sm:$0xf] %vm473_vm0, %v611_v43  ;;  %v666_v54 = vunpack.c.l.bf16 %v709_v44  ;;  %v667_v55 = vunpack.c.h.bf16 %v709_v44  ;;  %v670_v56 = vunpack.c.l.bf16 %v710_v45  ;;  %v671_v57 = vunpack.c.h.bf16 %v710_v45 }
  0x1b   : > { %478 = vst.msk [vmem:[%s808_s24 + $0x10] sm:$0xf] %vm473_vm0, %v612_v46  ;;  %479 = vst.msk [vmem:[%s808_s24 + $0x14] sm:$0xf] %vm473_vm0, %v613_v47  ;;  %v250_v58 = vmul.f32 %v658_v50, %v776_v0  ;;  %v251_v59 = vmul.f32 %v659_v51, %v776_v0  ;;  %v252_v60 = vmul.f32 %v662_v52, %v776_v0  ;;  %v674_v32 = vunpack.c.l.bf16 %v711_v20 }
  0x1c   : > { %480 = vst.msk [vmem:[%s808_s24 + $0x18] sm:$0xf] %vm473_vm0, %v614_v48  ;;  %481 = vst.msk [vmem:[%s808_s24 + $0x1c] sm:$0xf] %vm473_vm0, %v615_v49  ;;  %v253_v61 = vmul.f32 %v663_v53, %v776_v0  ;;  %v254_v62 = vmul.f32 %v666_v54, %v776_v0  ;;  %v255_v63 = vmul.f32 %v667_v55, %v776_v0  ;;  %v675_v33 = vunpack.c.h.bf16 %v711_v20 }
  0x1d   : > { %v256_v1 = vmul.f32 %v670_v56, %v776_v0  ;;  %v257_v2 = vmul.f32 %v671_v57, %v776_v0  ;;  %v289_v3 = vadd.f32 %v785_v9, %v250_v58  ;;  %v290_v4 = vadd.f32 %v785_v9, %v251_v59 }
  0x1e   : > { %v291_v5 = vadd.f32 %v785_v9, %v252_v60  ;;  %v292_v6 = vadd.f32 %v785_v9, %v253_v61  ;;  %v293_v7 = vadd.f32 %v785_v9, %v254_v62  ;;  %v294_v8 = vadd.f32 %v785_v9, %v255_v63 }
  0x1f   : > { %v295_v10 = vadd.f32 %v785_v9, %v256_v1  ;;  %v296_v11 = vadd.f32 %v785_v9, %v257_v2  ;;  %v321_v12 = vmax.f32 %v289_v3, 0.0  ;;  %v322_v13 = vmax.f32 %v290_v4, 0.0  ;;  %v715_v1 = vld [vmem:[%s771_s17 + $0x60] sm:$0xff]   ;;  %v716_v2 = vld [vmem:[%s771_s17 + $0x68] sm:$0xff]  }
  0x20   : > { %v323_v14 = vmax.f32 %v291_v5, 0.0  ;;  %v324_v15 = vmax.f32 %v292_v6, 0.0  ;;  %v325_v16 = vmax.f32 %v293_v7, 0.0  ;;  %v326_v17 = vmax.f32 %v294_v8, 0.0  ;;  %v717_v7 = vld [vmem:[%s771_s17 + $0x70] sm:$0xff]   ;;  %v718_v8 = vld [vmem:[%s771_s17 + $0x78] sm:$0xff]  }
  0x21   : > { %v327_v18 = vmax.f32 %v295_v10, 0.0  ;;  %v328_v19 = vmax.f32 %v296_v11, 0.0  ;;  %v616_v22 = vpack.c.bf16 %v321_v12, %v321_v12  ;;  %v617_v23 = vpack.c.bf16 %v322_v13, %v322_v13 }
  0x22   : > { %v618_v24 = vpack.c.bf16 %v323_v14, %v323_v14  ;;  %v619_v25 = vpack.c.bf16 %v324_v15, %v324_v15  ;;  %v620_v28 = vpack.c.bf16 %v325_v16, %v325_v16  ;;  %v621_v29 = vpack.c.bf16 %v326_v17, %v326_v17 }
  0x23   : > { %v622_v30 = vpack.c.bf16 %v327_v18, %v327_v18  ;;  %v623_v31 = vpack.c.bf16 %v328_v19, %v328_v19  ;;  %482 = vst.msk [vmem:[%s808_s24 + $0x20] sm:$0xf] %vm473_vm0, %v616_v22  ;;  %483 = vst.msk [vmem:[%s808_s24 + $0x24] sm:$0xf] %vm473_vm0, %v617_v23  ;;  %v678_v34 = vunpack.c.l.bf16 %v712_v21  ;;  %v679_v35 = vunpack.c.h.bf16 %v712_v21 }
  0x24   : > { %484 = vst.msk [vmem:[%s808_s24 + $0x28] sm:$0xf] %vm473_vm0, %v618_v24  ;;  %485 = vst.msk [vmem:[%s808_s24 + $0x2c] sm:$0xf] %vm473_vm0, %v619_v25  ;;  %v682_v36 = vunpack.c.l.bf16 %v713_v26  ;;  %v683_v37 = vunpack.c.h.bf16 %v713_v26  ;;  %v686_v38 = vunpack.c.l.bf16 %v714_v27  ;;  %v687_v39 = vunpack.c.h.bf16 %v714_v27 }
  0x25   : > { %486 = vst.msk [vmem:[%s808_s24 + $0x30] sm:$0xf] %vm473_vm0, %v620_v28  ;;  %487 = vst.msk [vmem:[%s808_s24 + $0x34] sm:$0xf] %vm473_vm0, %v621_v29  ;;  %v258_v40 = vmul.f32 %v674_v32, %v776_v0  ;;  %v259_v41 = vmul.f32 %v675_v33, %v776_v0  ;;  %v260_v42 = vmul.f32 %v678_v34, %v776_v0  ;;  %v690_v14 = vunpack.c.l.bf16 %v715_v1 }
  0x26   : > { %488 = vst.msk [vmem:[%s808_s24 + $0x38] sm:$0xf] %vm473_vm0, %v622_v30  ;;  %489 = vst.msk [vmem:[%s808_s24 + $0x3c] sm:$0xf] %vm473_vm0, %v623_v31  ;;  %v261_v43 = vmul.f32 %v679_v35, %v776_v0  ;;  %v262_v44 = vmul.f32 %v682_v36, %v776_v0  ;;  %v263_v45 = vmul.f32 %v683_v37, %v776_v0  ;;  %v691_v15 = vunpack.c.h.bf16 %v715_v1 }
  0x27   : > { %v264_v46 = vmul.f32 %v686_v38, %v776_v0  ;;  %v265_v47 = vmul.f32 %v687_v39, %v776_v0  ;;  %v297_v48 = vadd.f32 %v785_v9, %v258_v40  ;;  %v298_v49 = vadd.f32 %v785_v9, %v259_v41 }
  0x28   : > { %v299_v50 = vadd.f32 %v785_v9, %v260_v42  ;;  %v300_v51 = vadd.f32 %v785_v9, %v261_v43  ;;  %v301_v52 = vadd.f32 %v785_v9, %v262_v44  ;;  %v302_v53 = vadd.f32 %v785_v9, %v263_v45 }
  0x29   : > { %v303_v54 = vadd.f32 %v785_v9, %v264_v46  ;;  %v304_v55 = vadd.f32 %v785_v9, %v265_v47  ;;  %v329_v56 = vmax.f32 %v297_v48, 0.0  ;;  %v330_v57 = vmax.f32 %v298_v49, 0.0 }
  0x2a   : > { %v331_v58 = vmax.f32 %v299_v50, 0.0  ;;  %v332_v59 = vmax.f32 %v300_v51, 0.0  ;;  %v333_v60 = vmax.f32 %v301_v52, 0.0  ;;  %v334_v61 = vmax.f32 %v302_v53, 0.0 }
  0x2b   : > { %v335_v62 = vmax.f32 %v303_v54, 0.0  ;;  %v336_v63 = vmax.f32 %v304_v55, 0.0  ;;  %v624_v3 = vpack.c.bf16 %v329_v56, %v329_v56  ;;  %v625_v4 = vpack.c.bf16 %v330_v57, %v330_v57 }
  0x2c   : > { %v626_v5 = vpack.c.bf16 %v331_v58, %v331_v58  ;;  %v627_v6 = vpack.c.bf16 %v332_v59, %v332_v59  ;;  %v628_v10 = vpack.c.bf16 %v333_v60, %v333_v60  ;;  %v629_v11 = vpack.c.bf16 %v334_v61, %v334_v61 }
  0x2d   : > { %v630_v12 = vpack.c.bf16 %v335_v62, %v335_v62  ;;  %v631_v13 = vpack.c.bf16 %v336_v63, %v336_v63  ;;  %490 = vst.msk [vmem:[%s808_s24 + $0x40] sm:$0xf] %vm473_vm0, %v624_v3  ;;  %491 = vst.msk [vmem:[%s808_s24 + $0x44] sm:$0xf] %vm473_vm0, %v625_v4  ;;  %v694_v16 = vunpack.c.l.bf16 %v716_v2  ;;  %v695_v17 = vunpack.c.h.bf16 %v716_v2 }
  0x2e   : > { %492 = vst.msk [vmem:[%s808_s24 + $0x48] sm:$0xf] %vm473_vm0, %v626_v5  ;;  %493 = vst.msk [vmem:[%s808_s24 + $0x4c] sm:$0xf] %vm473_vm0, %v627_v6  ;;  %v698_v18 = vunpack.c.l.bf16 %v717_v7  ;;  %v699_v19 = vunpack.c.h.bf16 %v717_v7  ;;  %v702_v20 = vunpack.c.l.bf16 %v718_v8  ;;  %v703_v21 = vunpack.c.h.bf16 %v718_v8 }
  0x2f   : > { %494 = vst.msk [vmem:[%s808_s24 + $0x50] sm:$0xf] %vm473_vm0, %v628_v10  ;;  %495 = vst.msk [vmem:[%s808_s24 + $0x54] sm:$0xf] %vm473_vm0, %v629_v11  ;;  %v266_v22 = vmul.f32 %v690_v14, %v776_v0  ;;  %v267_v23 = vmul.f32 %v691_v15, %v776_v0  ;;  %v268_v24 = vmul.f32 %v694_v16, %v776_v0 }
  0x30   : > { %496 = vst.msk [vmem:[%s808_s24 + $0x58] sm:$0xf] %vm473_vm0, %v630_v12  ;;  %497 = vst.msk [vmem:[%s808_s24 + $0x5c] sm:$0xf] %vm473_vm0, %v631_v13  ;;  %v269_v25 = vmul.f32 %v695_v17, %v776_v0  ;;  %v270_v26 = vmul.f32 %v698_v18, %v776_v0  ;;  %v271_v27 = vmul.f32 %v699_v19, %v776_v0 }
  0x31   : > { %v272_v28 = vmul.f32 %v702_v20, %v776_v0  ;;  %v273_v29 = vmul.f32 %v703_v21, %v776_v0  ;;  %v305_v30 = vadd.f32 %v785_v9, %v266_v22  ;;  %v306_v31 = vadd.f32 %v785_v9, %v267_v23 }
  0x32   : > { %v307_v32 = vadd.f32 %v785_v9, %v268_v24  ;;  %v308_v33 = vadd.f32 %v785_v9, %v269_v25  ;;  %v309_v34 = vadd.f32 %v785_v9, %v270_v26  ;;  %v310_v35 = vadd.f32 %v785_v9, %v271_v27 }
  0x33   : > { %v311_v36 = vadd.f32 %v785_v9, %v272_v28  ;;  %v312_v37 = vadd.f32 %v785_v9, %v273_v29  ;;  %v337_v38 = vmax.f32 %v305_v30, 0.0  ;;  %v338_v39 = vmax.f32 %v306_v31, 0.0 }
  0x34   : > { %v339_v0 = vmax.f32 %v307_v32, 0.0  ;;  %v340_v40 = vmax.f32 %v308_v33, 0.0  ;;  %v341_v41 = vmax.f32 %v309_v34, 0.0  ;;  %v342_v42 = vmax.f32 %v310_v35, 0.0 }
  0x35   : > { %v343_v43 = vmax.f32 %v311_v36, 0.0  ;;  %v344_v44 = vmax.f32 %v312_v37, 0.0  ;;  %v632_v45 = vpack.c.bf16 %v337_v38, %v337_v38  ;;  %v633_v46 = vpack.c.bf16 %v338_v39, %v338_v39 }
  0x36   : > { %v634_v47 = vpack.c.bf16 %v339_v0, %v339_v0  ;;  %v635_v9 = vpack.c.bf16 %v340_v40, %v340_v40  ;;  %v636_v48 = vpack.c.bf16 %v341_v41, %v341_v41  ;;  %v637_v49 = vpack.c.bf16 %v342_v42, %v342_v42 }
  0x37   : > { %v638_v50 = vpack.c.bf16 %v343_v43, %v343_v43  ;;  %v639_v51 = vpack.c.bf16 %v344_v44, %v344_v44  ;;  %498 = vst.msk [vmem:[%s808_s24 + $0x60] sm:$0xf] %vm473_vm0, %v632_v45  ;;  %499 = vst.msk [vmem:[%s808_s24 + $0x64] sm:$0xf] %vm473_vm0, %v633_v46 }
  0x38   : > { %500 = vst.msk [vmem:[%s808_s24 + $0x68] sm:$0xf] %vm473_vm0, %v634_v47  ;;  %501 = vst.msk [vmem:[%s808_s24 + $0x6c] sm:$0xf] %vm473_vm0, %v635_v9 }
  0x39   : > { %502 = vst.msk [vmem:[%s808_s24 + $0x70] sm:$0xf] %vm473_vm0, %v636_v48  ;;  %503 = vst.msk [vmem:[%s808_s24 + $0x74] sm:$0xf] %vm473_vm0, %v637_v49 }
  0x3a   : > { %504 = vst.msk [vmem:[%s808_s24 + $0x78] sm:$0xf] %vm473_vm0, %v638_v50  ;;  %505 = vst.msk [vmem:[%s808_s24 + $0x7c] sm:$0xf] %vm473_vm0, %v639_v51 }
  0x3b PF: > { %s13_s12 = sadd.s32 1, %s733_s12  }
  0x3c   : > { %p10_p4 = scmp.ge.s32.totalorder %s13_s12, 4  }
  0x3e   :  { %12 = sbr.rel (!%p10_p4) target bundleno = 1 (0x1), region = 62 }

// kernel: double_conv.4
= control target key start
LH: loop header
LB: loop body
LE: loop exit
PB: predicated region body
PF: predicated region fallthrough
CT: control target
= control target key end

     0   :  { %s1212_s12 = smov 0   ;;  %s1373_s0 = inlined_call_operand.vmem [shape: bf16[2,256,36], index: 0, kind: input, shape index: {}]   ;;  %s1374_s1 = inlined_call_operand.vmem [shape: bf16[36,128], index: 1, kind: input, shape index: {}]   ;;  %s1375_s2 = inlined_call_operand.vmem [shape: bf16[2,256,128], index: 2, kind: output, shape index: {0}]   ;;  %s1376_s3 = inlined_call_operand.vmem [shape: f32[2,2,128], index: 3, kind: output, shape index: {1}]  }
   0x1 LB: > { %s884_s13 = sadd.s32 4294967295, %s1190_s12   ;;  %p888_p0 = scmp.ge.s32.totalorder %s1190_s12, 1  ;;  %s1190_s12 = sphi %s1212_s12, %s14_s12  }
   0x2   : > { %p140_p1 = scmp.lt.s32.totalorder %s1190_s12, 3 }
   0x4   : > { %p141_p2 = pnand %p888_p0, %p140_p1 }
   0x5   : > { %p168_p3 = scmp.lt.s32.totalorder (!%p141_p2), %s884_s13, 1 }
   0x6   : > { %144 = sbr.rel (%p141_p2) target bundleno = 301 (0x12d), region = 28 }
   0xb   : > { %v1165_v0 = vld [vmem:[%s1374_s1 + $0x10] ss:$0 sps:$4 sm:$0x33]   ;;  %vm364_vm0 = vcmask 1041408   ;;  %v1166_v1 = vld [vmem:[%s1374_s1 + $0x8] sm:$0xff]   ;;  %s1378_s13 = smov (!%p168_p3, %s884_s13), 1 }
   0xc   : > { %1155 = vmatprep.subr.msk.bf16.mxu0 %vm364_vm0, %v1165_v0  ;;  %v366_v2 = vsel %vm364_vm0, %v1165_v0, 0  ;;  %1156 = vmatprep.subr.msk.bf16.mxu1 %vm364_vm0, %v1165_v0  ;;  %v1167_v3 = vld [vmem:[%s1374_s1] sm:$0xff]   ;;  %s963_s20 = sshll.u32 %s1378_s13, 7  ;;  %vm315_vm1 = vcmask 293888   ;;  %s893_s27 = sshll.u32 %s1378_s13, 1  ;;  %vm795_vm2 = vcmask 1040384  }
   0xd   : > { %1112 = vmatpush3.bf16.msra.mxu0 %v366_v2  ;;  %1152 = vmatpush3.bf16.msra.mxu1 %v366_v2  ;;  %s1237_s23 = scalar_lea.vmem %s1373_s0, %s963_s20  ;;  %s1276_s26 = scalar_lea.vmem %s1375_s2, %s963_s20 }
   0xe   : > { %1113 = vmatprep.subr.bf16.mxu0 %v1166_v1  ;;  %1150 = vmatprep.subr.bf16.mxu1 %v1166_v1  ;;  %v1168_v4 = vld [vmem:[%s1237_s23] sm:$0xff]   ;;  %v1169_v5 = vld [vmem:[%s1237_s23 + $0x8] sm:$0xff]   ;;  %v1170_v6 = vld [vmem:[%s1237_s23 + $0x10] sm:$0xff]   ;;  %s181_s30 = scalar_lea.vmem %s1376_s3, %s893_s27 }
   0xf   : > { %1117 = vmatprep.mubr.msk.bf16.mxu0 %vm315_vm1, %v1168_v4  ;;  %v1176_v7 = vld [vmem:[%s1237_s23 + $0x40] sm:$0xff]   ;;  %v1177_v8 = vld [vmem:[%s1237_s23 + $0x48] sm:$0xff]   ;;  %v1178_v9 = vld [vmem:[%s1237_s23 + $0x50] sm:$0xff]  }
  0x10   : > { %1133 = vmatprep.mubr.msk.bf16.mxu1 %vm315_vm1, %v1176_v7  ;;  %v1171_v10 = vld [vmem:[%s1237_s23 + $0x18] sm:$0xff]   ;;  %v1172_v11 = vld [vmem:[%s1237_s23 + $0x20] sm:$0xff]   ;;  %v1173_v14 = vld [vmem:[%s1237_s23 + $0x28] sm:$0xff]  }
  0x11   : > { %1114 = vmatpush3.bf16.msra.mxu0 %v1166_v1  ;;  %1153 = vmatpush3.bf16.msra.mxu1 %v1166_v1  ;;  %v1179_v12 = vld [vmem:[%s1237_s23 + $0x58] sm:$0xff]   ;;  %v1180_v13 = vld [vmem:[%s1237_s23 + $0x60] sm:$0xff]   ;;  %v1174_v15 = vld [vmem:[%s1237_s23 + $0x30] sm:$0xff]  }
  0x12   : > { %1115 = vmatprep.subr.bf16.mxu0 %v1167_v3  ;;  %1151 = vmatprep.subr.bf16.mxu1 %v1167_v3  ;;  %v1181_v16 = vld [vmem:[%s1237_s23 + $0x68] sm:$0xff]   ;;  %v1182_v17 = vld [vmem:[%s1237_s23 + $0x70] sm:$0xff]   ;;  %v1175_v18 = vld [vmem:[%s1237_s23 + $0x38] sm:$0xff]  }
  0x13   : > { %v1183_v19 = vld [vmem:[%s1237_s23 + $0x78] sm:$0xff]  }
  0x15   : > { %1116 = vmatpush3.bf16.msra.mxu0 %v1167_v3  ;;  %1154 = vmatpush3.bf16.msra.mxu1 %v1167_v3 }
  0x18   : > { %1118 = vmatmul.mubr.msk.bf16.vlgmr.msra.gmra.mxu0 %vm315_vm1, %v1169_v5  ;;  %1134 = vmatmul.mubr.msk.bf16.vlgmr.msra.gmra.mxu1 %vm315_vm1, %v1177_v8 }
  0x19   : > { %1121 = vmatprep.mubr.msk.bf16.mxu0 %vm315_vm1, %v1170_v6  ;;  %1137 = vmatprep.mubr.msk.bf16.mxu1 %vm315_vm1, %v1178_v9 }
  0x20   : > { %1122 = vmatmul.mubr.msk.bf16.gmra.mxu0 %vm315_vm1, %v1171_v10  ;;  %1138 = vmatmul.mubr.msk.bf16.gmra.mxu1 %vm315_vm1, %v1179_v12 }
  0x21   : > { %1125 = vmatprep.mubr.msk.bf16.mxu0 %vm315_vm1, %v1172_v11  ;;  %1141 = vmatprep.mubr.msk.bf16.mxu1 %vm315_vm1, %v1180_v13 }
  0x28   : > { %1126 = vmatmul.mubr.msk.bf16.gmra.mxu0 %vm315_vm1, %v1173_v14  ;;  %1142 = vmatmul.mubr.msk.bf16.gmra.mxu1 %vm315_vm1, %v1181_v16 }
  0x29   : > { %1129 = vmatprep.mubr.msk.bf16.mxu0 %vm315_vm1, %v1174_v15  ;;  %1145 = vmatprep.mubr.msk.bf16.mxu1 %vm315_vm1, %v1182_v17 }
  0x30   : > { %1130 = vmatmul.mubr.msk.bf16.gmra.mxu0 %vm315_vm1, %v1175_v18  ;;  %1146 = vmatmul.mubr.msk.bf16.gmra.mxu1 %vm315_vm1, %v1183_v19 }
  0xd8   : > { %v1119_v20 = vpop.f32.mrf.mxu0  ;;  %v1278_v23 = vpop.f32.mrf.mxu1 }
  0xd9   : > { %v728_v33 = vmul.f32 %v1119_v20, %v1119_v20 }
  0xda   : > { %v402_v21 = vpop.f32.mrf.mxu0  ;;  %v1280_v26 = vpop.f32.mrf.mxu1 }
  0xdb   : > { %v726_v27 = vmul.f32 %v402_v21, %v402_v21 }
  0xdc   : > { %v1120_v22 = vpop.f32.mrf.mxu0  ;;  %v1283_v32 = vpop.f32.mrf.mxu1 }
  0xdd   : > { %v1005_v24 = vpack.c.bf16 %v1120_v22, %v1119_v20  ;;  %v1045_v36 = vpack.c.bf16 %v1283_v32, %v1278_v23  ;;  %v729_v39 = vmul.f32 %v1120_v22, %v1120_v22 }
  0xde   : > { %v405_v25 = vpop.f32.mrf.mxu0  ;;  %v1288_v38 = vpop.f32.mrf.mxu1 }
  0xdf   : > { %1077 = vst [vmem:[%s1276_s26 + $0x8] sm:$0xff] %v1005_v24   ;;  %v1000_v28 = vpack.c.bf16 %v405_v25, %v402_v21  ;;  %v689_v29 = vadd.f32 %v405_v25, %v402_v21  ;;  %v727_v30 = vmul.f32 %v405_v25, %v405_v25  ;;  %1085 = vst [vmem:[%s1276_s26 + $0x48] sm:$0xff] %v1045_v36  }
  0xe0   : > { %v1123_v31 = vpop.f32.mrf.mxu0  ;;  %v1040_v42 = vpack.c.bf16 %v1288_v38, %v1280_v26  ;;  %v1293_v44 = vpop.f32.mrf.mxu1 }
  0xe1   : > { %1001 = vst [vmem:[%s1276_s26] sm:$0xff] %v1000_v28   ;;  %v690_v34 = vadd.f32 %v1119_v20, %v689_v29  ;;  %v758_v35 = vadd.f32 %v727_v30, %v726_v27  ;;  %v732_v57 = vmul.f32 %v1123_v31, %v1123_v31 }
  0xe2   : > { %v418_v37 = vpop.f32.mrf.mxu0  ;;  %1084 = vst [vmem:[%s1276_s26 + $0x40] sm:$0xff] %v1040_v42   ;;  %v1296_v50 = vpop.f32.mrf.mxu1 }
  0xe3   : > { %v759_v40 = vadd.f32 %v758_v35, %v728_v33  ;;  %v691_v41 = vadd.f32 %v1120_v22, %v690_v34  ;;  %v730_v46 = vmul.f32 %v418_v37, %v418_v37 }
  0xe4   : > { %v1124_v43 = vpop.f32.mrf.mxu0  ;;  %v1299_v56 = vpop.f32.mrf.mxu1 }
  0xe5   : > { %v692_v45 = vadd.f32 %v691_v41, %v418_v37  ;;  %v760_v47 = vadd.f32 %v759_v40, %v729_v39  ;;  %v1015_v48 = vpack.c.bf16 %v1124_v43, %v1123_v31  ;;  %v1055_v60 = vpack.c.bf16 %v1299_v56, %v1293_v44 }
  0xe6   : > { %v421_v49 = vpop.f32.mrf.mxu0  ;;  %v1304_v62 = vpop.f32.mrf.mxu1  ;;  %v733_v63 = vmul.f32 %v1124_v43, %v1124_v43 }
  0xe7   : > { %v761_v51 = vadd.f32 %v760_v47, %v730_v46  ;;  %1079 = vst [vmem:[%s1276_s26 + $0x18] sm:$0xff] %v1015_v48   ;;  %v1010_v52 = vpack.c.bf16 %v421_v49, %v418_v37  ;;  %v693_v53 = vadd.f32 %v692_v45, %v421_v49  ;;  %v731_v54 = vmul.f32 %v421_v49, %v421_v49 }
  0xe8   : > { %v1127_v55 = vpop.f32.mrf.mxu0  ;;  %1087 = vst [vmem:[%s1276_s26 + $0x58] sm:$0xff] %v1055_v60   ;;  %v1050_v2 = vpack.c.bf16 %v1304_v62, %v1296_v50  ;;  %v1309_v4 = vpop.f32.mrf.mxu1  ;;  %v743_v60 = vmul.f32 %v1288_v38, %v1288_v38 }
  0xe9   : > { %1078 = vst [vmem:[%s1276_s26 + $0x10] sm:$0xff] %v1010_v52   ;;  %v694_v58 = vadd.f32 %v1123_v31, %v693_v53  ;;  %v762_v59 = vadd.f32 %v761_v51, %v731_v54  ;;  %v736_v17 = vmul.f32 %v1127_v55, %v1127_v55 }
  0xea   : > { %v434_v61 = vpop.f32.mrf.mxu0  ;;  %1086 = vst [vmem:[%s1276_s26 + $0x50] sm:$0xff] %v1050_v2   ;;  %v1312_v10 = vpop.f32.mrf.mxu1  ;;  %v745_v2 = vmul.f32 %v1283_v32, %v1283_v32 }
  0xeb   : > { %v763_v0 = vadd.f32 %v762_v59, %v732_v57  ;;  %v695_v1 = vadd.f32 %v1124_v43, %v694_v58  ;;  %v734_v6 = vmul.f32 %v434_v61, %v434_v61 }
  0xec   : > { %v1128_v3 = vpop.f32.mrf.mxu0  ;;  %v1315_v16 = vpop.f32.mrf.mxu1 }
  0xed   : > { %v696_v5 = vadd.f32 %v695_v1, %v434_v61  ;;  %v764_v7 = vadd.f32 %v763_v0, %v733_v63  ;;  %v1025_v8 = vpack.c.bf16 %v1128_v3, %v1127_v55  ;;  %v1065_v20 = vpack.c.bf16 %v1315_v16, %v1309_v4 }
  0xee   : > { %v437_v9 = vpop.f32.mrf.mxu0  ;;  %v501_v22 = vpop.f32.mrf.mxu1  ;;  %v737_v24 = vmul.f32 %v1128_v3, %v1128_v3  ;;  %v744_v63 = vmul.f32 %v1278_v23, %v1278_v23 }
  0xef   : > { %v765_v11 = vadd.f32 %v764_v7, %v734_v6  ;;  %1081 = vst [vmem:[%s1276_s26 + $0x28] sm:$0xff] %v1025_v8   ;;  %v1020_v12 = vpack.c.bf16 %v437_v9, %v434_v61  ;;  %v697_v13 = vadd.f32 %v696_v5, %v437_v9  ;;  %v735_v14 = vmul.f32 %v437_v9, %v437_v9 }
  0xf0   : > { %v1131_v15 = vpop.f32.mrf.mxu0  ;;  %1089 = vst [vmem:[%s1276_s26 + $0x68] sm:$0xff] %v1065_v20   ;;  %v1060_v28 = vpack.c.bf16 %v501_v22, %v1312_v10  ;;  %v1322_v30 = vpop.f32.mrf.mxu1  ;;  %v746_v6 = vmul.f32 %v1296_v50, %v1296_v50  ;;  %v747_v9 = vmul.f32 %v1304_v62, %v1304_v62  ;;  %v752_v20 = vmul.f32 %v1309_v4, %v1309_v4 }
  0xf1   : > { %1080 = vst [vmem:[%s1276_s26 + $0x20] sm:$0xff] %v1020_v12   ;;  %v698_v18 = vadd.f32 %v1127_v55, %v697_v13  ;;  %v766_v19 = vadd.f32 %v765_v11, %v735_v14  ;;  %v740_v45 = vmul.f32 %v1131_v15, %v1131_v15  ;;  %v742_v55 = vmul.f32 %v1280_v26, %v1280_v26 }
  0xf2   : > { %v450_v21 = vpop.f32.mrf.mxu0  ;;  %1088 = vst [vmem:[%s1276_s26 + $0x60] sm:$0xff] %v1060_v28   ;;  %v514_v37 = vpop.f32.mrf.mxu1 }
  0xf3   : > { %v767_v25 = vadd.f32 %v766_v19, %v736_v17  ;;  %v699_v27 = vadd.f32 %v1128_v3, %v698_v18  ;;  %v738_v33 = vmul.f32 %v450_v21, %v450_v21  ;;  %v751_v19 = vmul.f32 %v501_v22, %v501_v22 }
  0xf4   : > { %v1132_v29 = vpop.f32.mrf.mxu0  ;;  %v1148_v43 = vpop.f32.mrf.mxu1  ;;  %v754_v28 = vmul.f32 %v514_v37, %v514_v37 }
  0xf5   : > { %v700_v31 = vadd.f32 %v699_v27, %v450_v21  ;;  %v768_v34 = vadd.f32 %v767_v25, %v737_v24  ;;  %v1035_v35 = vpack.c.bf16 %v1132_v29, %v1131_v15  ;;  %v1075_v48 = vpack.c.bf16 %v1148_v43, %v1322_v30 }
  0xf6   : > { %v453_v36 = vpop.f32.mrf.mxu0  ;;  %v517_v49 = vpop.f32.mrf.mxu1  ;;  %v741_v51 = vmul.f32 %v1132_v29, %v1132_v29  ;;  %v753_v24 = vmul.f32 %v1315_v16, %v1315_v16 }
  0xf7   : > { %v769_v39 = vadd.f32 %v768_v34, %v738_v33  ;;  %1083 = vst [vmem:[%s1276_s26 + $0x38] sm:$0xff] %v1035_v35   ;;  %v1030_v40 = vpack.c.bf16 %v453_v36, %v450_v21  ;;  %v701_v41 = vadd.f32 %v700_v31, %v453_v36  ;;  %v739_v42 = vmul.f32 %v453_v36, %v453_v36 }
  0xf8   : > { %1091 = vst [vmem:[%s1276_s26 + $0x78] sm:$0xff] %v1075_v48   ;;  %v1070_v54 = vpack.c.bf16 %v517_v49, %v514_v37  ;;  %v755_v33 = vmul.f32 %v517_v49, %v517_v49  ;;  %v757_v35 = vmul.f32 %v1148_v43, %v1148_v43 }
  0xf9   : > { %1082 = vst [vmem:[%s1276_s26 + $0x30] sm:$0xff] %v1030_v40   ;;  %v702_v46 = vadd.f32 %v1131_v15, %v701_v41  ;;  %v770_v47 = vadd.f32 %v769_v39, %v739_v42  ;;  %v750_v15 = vmul.f32 %v1312_v10, %v1312_v10 }
  0xfa   : > { %1090 = vst [vmem:[%s1276_s26 + $0x70] sm:$0xff] %v1070_v54  }
  0xfb   : > { %v703_v52 = vadd.f32 %v1132_v29, %v702_v46  ;;  %v771_v53 = vadd.f32 %v770_v47, %v740_v45 }
  0xfd   : > { %v772_v57 = vadd.f32 %v771_v53, %v741_v51  ;;  %v704_v58 = vadd.f32 %v703_v52, %v1280_v26 }
  0xff   : > { %v705_v59 = vadd.f32 %v704_v58, %v1288_v38  ;;  %v773_v61 = vadd.f32 %v772_v57, %v742_v55 }
 0x101   : > { %v706_v0 = vadd.f32 %v1278_v23, %v705_v59  ;;  %v774_v1 = vadd.f32 %v773_v61, %v743_v60  ;;  %v748_v23 = vmul.f32 %v1293_v44, %v1293_v44 }
 0x103   : > { %v775_v3 = vadd.f32 %v774_v1, %v744_v63  ;;  %v707_v5 = vadd.f32 %v1283_v32, %v706_v0  ;;  %v749_v32 = vmul.f32 %v1299_v56, %v1299_v56 }
 0x105   : > { %v708_v26 = vadd.f32 %v707_v5, %v1296_v50  ;;  %v776_v7 = vadd.f32 %v775_v3, %v745_v2 }
 0x107   : > { %v777_v38 = vadd.f32 %v776_v7, %v746_v6  ;;  %v709_v8 = vadd.f32 %v708_v26, %v1304_v62 }
 0x109   : > { %v710_v11 = vadd.f32 %v1293_v44, %v709_v8  ;;  %v778_v12 = vadd.f32 %v777_v38, %v747_v9 }
 0x10b   : > { %v779_v13 = vadd.f32 %v778_v12, %v748_v23  ;;  %v711_v14 = vadd.f32 %v1299_v56, %v710_v11 }
 0x10d   : > { %v712_v50 = vadd.f32 %v711_v14, %v1312_v10  ;;  %v780_v17 = vadd.f32 %v779_v13, %v749_v32 }
 0x10f   : > { %v781_v18 = vadd.f32 %v780_v17, %v750_v15  ;;  %v713_v62 = vadd.f32 %v712_v50, %v501_v22  ;;  %v756_v22 = vmul.f32 %v1322_v30, %v1322_v30 }
 0x111   : > { %v714_v44 = vadd.f32 %v1309_v4, %v713_v62  ;;  %v782_v21 = vadd.f32 %v781_v18, %v751_v19 }
 0x113   : > { %v783_v25 = vadd.f32 %v782_v21, %v752_v20  ;;  %v715_v56 = vadd.f32 %v1315_v16, %v714_v44 }
 0x115   : > { %v716_v27 = vadd.f32 %v715_v56, %v514_v37  ;;  %v784_v29 = vadd.f32 %v783_v25, %v753_v24 }
 0x117   : > { %v785_v10 = vadd.f32 %v784_v29, %v754_v28  ;;  %v717_v31 = vadd.f32 %v716_v27, %v517_v49 }
 0x119   : > { %v718_v34 = vadd.f32 %v1322_v30, %v717_v31  ;;  %v786_v4 = vadd.f32 %v785_v10, %v755_v33 }
 0x11b   : > { %v719_v36 = vadd.f32 %v1148_v43, %v718_v34  ;;  %v787_v39 = vadd.f32 %v786_v4, %v756_v22 }
 0x11d   : > { %v720_v40 = vrot.slane %v719_v36, 4  ;;  %v788_v41 = vadd.f32 %v787_v39, %v757_v35 }
 0x11f   : > { %v721_v42 = vadd.f32 %v720_v40, %v719_v36  ;;  %v789_v16 = vrot.slane %v788_v41, 4 }
 0x121   : > { %v722_v45 = vrot.slane %v721_v42, 2  ;;  %v790_v37 = vadd.f32 %v789_v16, %v788_v41 }
 0x123   : > { %v723_v46 = vadd.f32 %v722_v45, %v721_v42  ;;  %v791_v47 = vrot.slane %v790_v37, 2 }
 0x125   : > { %v724_v48 = vrot.slane %v723_v46, 1  ;;  %v792_v49 = vadd.f32 %v791_v47, %v790_v37 }
 0x127   : > { %v793_v51 = vrot.slane %v792_v49, 1  ;;  %v725_v30 = vadd.f32 %v724_v48, %v723_v46 }
 0x129   : > { %v794_v43 = vadd.f32 %v793_v51, %v792_v49 }
 0x12b   : > { %v796_v52 = vsel %vm795_vm2, %v725_v30, %v794_v43 }
 0x12c   : > { %797 = vst [vmem:[%s181_s30] sm:$0x3] %v796_v52 }
 0x12d PF: > { %s14_s12 = sadd.s32 1, %s1190_s12  }
 0x12e   : > { %p11_p4 = scmp.ge.s32.totalorder %s14_s12, 4  }
 0x130   :  { %13 = sbr.rel (!%p11_p4) target bundleno = 1 (0x1), region = 70 }

// kernel: double_conv.7
= control target key start
LH: loop header
LB: loop body
LE: loop exit
PB: predicated region body
PF: predicated region fallthrough
CT: control target
= control target key end

     0   :  { %s563_s12 = smov 0   ;;  %s742_s0 = inlined_call_operand.vmem [shape: bf16[2,256,128], index: 0, kind: input, shape index: {}]   ;;  %s743_s1 = inlined_call_operand.vmem [shape: f32[1,128], index: 1, kind: input, shape index: {}]   ;;  %s744_s2 = inlined_call_operand.vmem [shape: f32[1,128], index: 2, kind: input, shape index: {}]   ;;  %s745_s3 = inlined_call_operand.vmem [shape: f32[2,256,8], index: 3, kind: output, shape index: {}]  }
   0x1 LB: > { %s433_s13 = sadd.s32 4294967295, %s541_s12   ;;  %p437_p0 = scmp.ge.s32.totalorder %s541_s12, 1  ;;  %s541_s12 = sphi %s563_s12, %s13_s12  }
   0x2   : > { %p137_p1 = scmp.lt.s32.totalorder %s541_s12, 3 }
   0x4   : > { %p138_p2 = pnand %p437_p0, %p137_p1 }
   0x5   : > { %p161_p3 = scmp.lt.s32.totalorder (!%p138_p2), %s433_s13, 1 }
   0x6   : > { %141 = sbr.rel (%p138_p2) target bundleno = 51 (0x33), region = 32 }
   0xb   : > { %s747_s13 = smov (!%p161_p3, %s433_s13), 1  ;;  %v582_v0 = vld [vmem:[%s743_s1] ss:$0 sm:$0xff]  ;;  %vm345_vm0 = vcmask 64512  }
   0xc   : > { %s446_s14 = sshll.u32 %s747_s13, 7  ;;  %v591_v9 = vld [vmem:[%s744_s2] ss:$0 sm:$0xff]  ;;  %s447_s22 = sshll.u32 %s747_s13, 8 }
   0xd   : > { %s577_s17 = scalar_lea.vmem %s742_s0, %s446_s14  ;;  %s609_s25 = scalar_lea.vmem %s745_s3, %s447_s22 }
   0xe   : > { %v449_v1 = vld [vmem:[%s577_s17] sm:$0xff]   ;;  %v512_v2 = vld [vmem:[%s577_s17 + $0x8] sm:$0xff]   ;;  %v513_v3 = vld [vmem:[%s577_s17 + $0x10] sm:$0xff]  }
   0xf   : > { %v450_v4 = vunpack.c.l.bf16 %v449_v1  ;;  %v451_v5 = vunpack.c.h.bf16 %v449_v1  ;;  %v454_v6 = vunpack.c.l.bf16 %v512_v2  ;;  %v455_v7 = vunpack.c.h.bf16 %v512_v2  ;;  %v514_v8 = vld [vmem:[%s577_s17 + $0x18] sm:$0xff]   ;;  %v515_v30 = vld [vmem:[%s577_s17 + $0x20] sm:$0xff]   ;;  %v516_v31 = vld [vmem:[%s577_s17 + $0x28] sm:$0xff]  }
  0x10   : > { %v458_v10 = vunpack.c.l.bf16 %v513_v3  ;;  %v459_v11 = vunpack.c.h.bf16 %v513_v3  ;;  %v462_v12 = vunpack.c.l.bf16 %v514_v8  ;;  %v463_v13 = vunpack.c.h.bf16 %v514_v8  ;;  %v517_v36 = vld [vmem:[%s577_s17 + $0x30] sm:$0xff]   ;;  %v518_v37 = vld [vmem:[%s577_s17 + $0x38] sm:$0xff]   ;;  %v519_v3 = vld [vmem:[%s577_s17 + $0x40] sm:$0xff]  }
  0x11   : > { %v242_v14 = vmul.f32 %v450_v4, %v582_v0  ;;  %v243_v15 = vmul.f32 %v451_v5, %v582_v0  ;;  %v244_v16 = vmul.f32 %v454_v6, %v582_v0  ;;  %v245_v17 = vmul.f32 %v455_v7, %v582_v0  ;;  %v520_v4 = vld [vmem:[%s577_s17 + $0x48] sm:$0xff]  }
  0x12   : > { %v246_v18 = vmul.f32 %v458_v10, %v582_v0  ;;  %v247_v19 = vmul.f32 %v459_v11, %v582_v0  ;;  %v248_v20 = vmul.f32 %v462_v12, %v582_v0  ;;  %v249_v21 = vmul.f32 %v463_v13, %v582_v0  ;;  %v521_v10 = vld [vmem:[%s577_s17 + $0x50] sm:$0xff]   ;;  %v522_v11 = vld [vmem:[%s577_s17 + $0x58] sm:$0xff]  }
  0x13   : > { %v281_v22 = vadd.f32 %v591_v9, %v242_v14  ;;  %v282_v23 = vadd.f32 %v591_v9, %v243_v15  ;;  %v283_v24 = vadd.f32 %v591_v9, %v244_v16  ;;  %v284_v25 = vadd.f32 %v591_v9, %v245_v17 }
  0x14   : > { %v285_v26 = vadd.f32 %v591_v9, %v246_v18  ;;  %v286_v27 = vadd.f32 %v591_v9, %v247_v19  ;;  %v287_v28 = vadd.f32 %v591_v9, %v248_v20  ;;  %v288_v29 = vadd.f32 %v591_v9, %v249_v21 }
  0x15   : > { %v313_v32 = vmax.f32 %v281_v22, 0.0  ;;  %v314_v33 = vmax.f32 %v282_v23, 0.0  ;;  %v315_v34 = vmax.f32 %v283_v24, 0.0  ;;  %v316_v35 = vmax.f32 %v284_v25, 0.0 }
  0x16   : > { %v317_v38 = vmax.f32 %v285_v26, 0.0  ;;  %v318_v39 = vmax.f32 %v286_v27, 0.0  ;;  %v319_v40 = vmax.f32 %v287_v28, 0.0  ;;  %v320_v41 = vmax.f32 %v288_v29, 0.0 }
  0x17   : > { %346 = vst.msk [vmem:[%s609_s25] sm:$0xff] %vm345_vm0, %v313_v32  ;;  %347 = vst.msk [vmem:[%s609_s25 + $0x8] sm:$0xff] %vm345_vm0, %v314_v33  ;;  %v466_v42 = vunpack.c.l.bf16 %v515_v30  ;;  %v467_v43 = vunpack.c.h.bf16 %v515_v30  ;;  %v470_v44 = vunpack.c.l.bf16 %v516_v31  ;;  %v471_v45 = vunpack.c.h.bf16 %v516_v31 }
  0x18   : > { %348 = vst.msk [vmem:[%s609_s25 + $0x10] sm:$0xff] %vm345_vm0, %v315_v34  ;;  %349 = vst.msk [vmem:[%s609_s25 + $0x18] sm:$0xff] %vm345_vm0, %v316_v35  ;;  %v474_v46 = vunpack.c.l.bf16 %v517_v36  ;;  %v475_v47 = vunpack.c.h.bf16 %v517_v36  ;;  %v478_v48 = vunpack.c.l.bf16 %v518_v37  ;;  %v479_v49 = vunpack.c.h.bf16 %v518_v37 }
  0x19   : > { %350 = vst.msk [vmem:[%s609_s25 + $0x20] sm:$0xff] %vm345_vm0, %v317_v38  ;;  %351 = vst.msk [vmem:[%s609_s25 + $0x28] sm:$0xff] %vm345_vm0, %v318_v39  ;;  %v250_v50 = vmul.f32 %v466_v42, %v582_v0  ;;  %v251_v51 = vmul.f32 %v467_v43, %v582_v0  ;;  %v252_v52 = vmul.f32 %v470_v44, %v582_v0  ;;  %v482_v16 = vunpack.c.l.bf16 %v519_v3 }
  0x1a   : > { %352 = vst.msk [vmem:[%s609_s25 + $0x30] sm:$0xff] %vm345_vm0, %v319_v40  ;;  %353 = vst.msk [vmem:[%s609_s25 + $0x38] sm:$0xff] %vm345_vm0, %v320_v41  ;;  %v253_v53 = vmul.f32 %v471_v45, %v582_v0  ;;  %v254_v54 = vmul.f32 %v474_v46, %v582_v0  ;;  %v255_v55 = vmul.f32 %v475_v47, %v582_v0  ;;  %v483_v17 = vunpack.c.h.bf16 %v519_v3  ;;  %v523_v40 = vld [vmem:[%s577_s17 + $0x60] sm:$0xff]   ;;  %v524_v41 = vld [vmem:[%s577_s17 + $0x68] sm:$0xff]  }
  0x1b   : > { %v256_v56 = vmul.f32 %v478_v48, %v582_v0  ;;  %v257_v57 = vmul.f32 %v479_v49, %v582_v0  ;;  %v289_v58 = vadd.f32 %v591_v9, %v250_v50  ;;  %v290_v59 = vadd.f32 %v591_v9, %v251_v51  ;;  %v525_v46 = vld [vmem:[%s577_s17 + $0x70] sm:$0xff]   ;;  %v526_v47 = vld [vmem:[%s577_s17 + $0x78] sm:$0xff]  }
  0x1c   : > { %v291_v60 = vadd.f32 %v591_v9, %v252_v52  ;;  %v292_v61 = vadd.f32 %v591_v9, %v253_v53  ;;  %v293_v62 = vadd.f32 %v591_v9, %v254_v54  ;;  %v294_v63 = vadd.f32 %v591_v9, %v255_v55 }
  0x1d   : > { %v295_v1 = vadd.f32 %v591_v9, %v256_v56  ;;  %v296_v2 = vadd.f32 %v591_v9, %v257_v57  ;;  %v321_v5 = vmax.f32 %v289_v58, 0.0  ;;  %v322_v6 = vmax.f32 %v290_v59, 0.0 }
  0x1e   : > { %v323_v7 = vmax.f32 %v291_v60, 0.0  ;;  %v324_v8 = vmax.f32 %v292_v61, 0.0  ;;  %v325_v12 = vmax.f32 %v293_v62, 0.0  ;;  %v326_v13 = vmax.f32 %v294_v63, 0.0 }
  0x1f   : > { %v327_v14 = vmax.f32 %v295_v1, 0.0  ;;  %v328_v15 = vmax.f32 %v296_v2, 0.0  ;;  %354 = vst.msk [vmem:[%s609_s25 + $0x40] sm:$0xff] %vm345_vm0, %v321_v5  ;;  %355 = vst.msk [vmem:[%s609_s25 + $0x48] sm:$0xff] %vm345_vm0, %v322_v6  ;;  %v486_v18 = vunpack.c.l.bf16 %v520_v4  ;;  %v487_v19 = vunpack.c.h.bf16 %v520_v4 }
  0x20   : > { %356 = vst.msk [vmem:[%s609_s25 + $0x50] sm:$0xff] %vm345_vm0, %v323_v7  ;;  %357 = vst.msk [vmem:[%s609_s25 + $0x58] sm:$0xff] %vm345_vm0, %v324_v8  ;;  %v490_v20 = vunpack.c.l.bf16 %v521_v10  ;;  %v491_v21 = vunpack.c.h.bf16 %v521_v10  ;;  %v494_v22 = vunpack.c.l.bf16 %v522_v11  ;;  %v495_v23 = vunpack.c.h.bf16 %v522_v11 }
  0x21   : > { %358 = vst.msk [vmem:[%s609_s25 + $0x60] sm:$0xff] %vm345_vm0, %v325_v12  ;;  %359 = vst.msk [vmem:[%s609_s25 + $0x68] sm:$0xff] %vm345_vm0, %v326_v13  ;;  %v258_v24 = vmul.f32 %v482_v16, %v582_v0  ;;  %v259_v25 = vmul.f32 %v483_v17, %v582_v0  ;;  %v260_v26 = vmul.f32 %v486_v18, %v582_v0  ;;  %v498_v52 = vunpack.c.l.bf16 %v523_v40 }
  0x22   : > { %360 = vst.msk [vmem:[%s609_s25 + $0x70] sm:$0xff] %vm345_vm0, %v327_v14  ;;  %361 = vst.msk [vmem:[%s609_s25 + $0x78] sm:$0xff] %vm345_vm0, %v328_v15  ;;  %v261_v27 = vmul.f32 %v487_v19, %v582_v0  ;;  %v262_v28 = vmul.f32 %v490_v20, %v582_v0  ;;  %v263_v29 = vmul.f32 %v491_v21, %v582_v0  ;;  %v499_v53 = vunpack.c.h.bf16 %v523_v40 }
  0x23   : > { %v264_v30 = vmul.f32 %v494_v22, %v582_v0  ;;  %v265_v31 = vmul.f32 %v495_v23, %v582_v0  ;;  %v297_v32 = vadd.f32 %v591_v9, %v258_v24  ;;  %v298_v33 = vadd.f32 %v591_v9, %v259_v25 }
  0x24   : > { %v299_v34 = vadd.f32 %v591_v9, %v260_v26  ;;  %v300_v35 = vadd.f32 %v591_v9, %v261_v27  ;;  %v301_v36 = vadd.f32 %v591_v9, %v262_v28  ;;  %v302_v37 = vadd.f32 %v591_v9, %v263_v29 }
  0x25   : > { %v303_v38 = vadd.f32 %v591_v9, %v264_v30  ;;  %v304_v39 = vadd.f32 %v591_v9, %v265_v31  ;;  %v329_v42 = vmax.f32 %v297_v32, 0.0  ;;  %v330_v43 = vmax.f32 %v298_v33, 0.0 }
  0x26   : > { %v331_v44 = vmax.f32 %v299_v34, 0.0  ;;  %v332_v45 = vmax.f32 %v300_v35, 0.0  ;;  %v333_v48 = vmax.f32 %v301_v36, 0.0  ;;  %v334_v49 = vmax.f32 %v302_v37, 0.0 }
  0x27   : > { %v335_v50 = vmax.f32 %v303_v38, 0.0  ;;  %v336_v51 = vmax.f32 %v304_v39, 0.0  ;;  %362 = vst.msk [vmem:[%s609_s25 + $0x80] sm:$0xff] %vm345_vm0, %v329_v42  ;;  %363 = vst.msk [vmem:[%s609_s25 + $0x88] sm:$0xff] %vm345_vm0, %v330_v43  ;;  %v502_v54 = vunpack.c.l.bf16 %v524_v41  ;;  %v503_v55 = vunpack.c.h.bf16 %v524_v41 }
  0x28   : > { %364 = vst.msk [vmem:[%s609_s25 + $0x90] sm:$0xff] %vm345_vm0, %v331_v44  ;;  %365 = vst.msk [vmem:[%s609_s25 + $0x98] sm:$0xff] %vm345_vm0, %v332_v45  ;;  %v506_v56 = vunpack.c.l.bf16 %v525_v46  ;;  %v507_v57 = vunpack.c.h.bf16 %v525_v46  ;;  %v510_v58 = vunpack.c.l.bf16 %v526_v47  ;;  %v511_v59 = vunpack.c.h.bf16 %v526_v47 }
  0x29   : > { %366 = vst.msk [vmem:[%s609_s25 + $0xa0] sm:$0xff] %vm345_vm0, %v333_v48  ;;  %367 = vst.msk [vmem:[%s609_s25 + $0xa8] sm:$0xff] %vm345_vm0, %v334_v49  ;;  %v266_v60 = vmul.f32 %v498_v52, %v582_v0  ;;  %v267_v61 = vmul.f32 %v499_v53, %v582_v0  ;;  %v268_v62 = vmul.f32 %v502_v54, %v582_v0 }
  0x2a   : > { %368 = vst.msk [vmem:[%s609_s25 + $0xb0] sm:$0xff] %vm345_vm0, %v335_v50  ;;  %369 = vst.msk [vmem:[%s609_s25 + $0xb8] sm:$0xff] %vm345_vm0, %v336_v51  ;;  %v269_v63 = vmul.f32 %v503_v55, %v582_v0  ;;  %v270_v1 = vmul.f32 %v506_v56, %v582_v0  ;;  %v271_v2 = vmul.f32 %v507_v57, %v582_v0 }
  0x2b   : > { %v272_v3 = vmul.f32 %v510_v58, %v582_v0  ;;  %v273_v4 = vmul.f32 %v511_v59, %v582_v0  ;;  %v305_v5 = vadd.f32 %v591_v9, %v266_v60  ;;  %v306_v6 = vadd.f32 %v591_v9, %v267_v61 }
  0x2c   : > { %v307_v7 = vadd.f32 %v591_v9, %v268_v62  ;;  %v308_v8 = vadd.f32 %v591_v9, %v269_v63  ;;  %v309_v10 = vadd.f32 %v591_v9, %v270_v1  ;;  %v310_v11 = vadd.f32 %v591_v9, %v271_v2 }
  0x2d   : > { %v311_v0 = vadd.f32 %v591_v9, %v272_v3  ;;  %v312_v12 = vadd.f32 %v591_v9, %v273_v4  ;;  %v337_v13 = vmax.f32 %v305_v5, 0.0  ;;  %v338_v14 = vmax.f32 %v306_v6, 0.0 }
  0x2e   : > { %v339_v15 = vmax.f32 %v307_v7, 0.0  ;;  %v340_v16 = vmax.f32 %v308_v8, 0.0  ;;  %v341_v17 = vmax.f32 %v309_v10, 0.0  ;;  %v342_v18 = vmax.f32 %v310_v11, 0.0 }
  0x2f   : > { %v343_v19 = vmax.f32 %v311_v0, 0.0  ;;  %v344_v20 = vmax.f32 %v312_v12, 0.0  ;;  %370 = vst.msk [vmem:[%s609_s25 + $0xc0] sm:$0xff] %vm345_vm0, %v337_v13  ;;  %371 = vst.msk [vmem:[%s609_s25 + $0xc8] sm:$0xff] %vm345_vm0, %v338_v14 }
  0x30   : > { %372 = vst.msk [vmem:[%s609_s25 + $0xd0] sm:$0xff] %vm345_vm0, %v339_v15  ;;  %373 = vst.msk [vmem:[%s609_s25 + $0xd8] sm:$0xff] %vm345_vm0, %v340_v16 }
  0x31   : > { %374 = vst.msk [vmem:[%s609_s25 + $0xe0] sm:$0xff] %vm345_vm0, %v341_v17  ;;  %375 = vst.msk [vmem:[%s609_s25 + $0xe8] sm:$0xff] %vm345_vm0, %v342_v18 }
  0x32   : > { %376 = vst.msk [vmem:[%s609_s25 + $0xf0] sm:$0xff] %vm345_vm0, %v343_v19  ;;  %377 = vst.msk [vmem:[%s609_s25 + $0xf8] sm:$0xff] %vm345_vm0, %v344_v20 }
  0x33 PF: > { %s13_s12 = sadd.s32 1, %s541_s12  }
  0x34   : > { %p10_p4 = scmp.ge.s32.totalorder %s13_s12, 4  }
  0x36   :  { %12 = sbr.rel (!%p10_p4) target bundleno = 1 (0x1), region = 62 }

// kernel: double_conv.6
= control target key start
LH: loop header
LB: loop body
LE: loop exit
PB: predicated region body
PF: predicated region fallthrough
CT: control target
= control target key end

     0   :  { %s1242_s12 = smov 0   ;;  %s1421_s0 = inlined_call_operand.vmem [shape: bf16[2,256,72], index: 0, kind: input, shape index: {}]   ;;  %s1422_s1 = inlined_call_operand.vmem [shape: bf16[72,128], index: 1, kind: input, shape index: {}]   ;;  %s1423_s2 = inlined_call_operand.vmem [shape: bf16[2,256,128], index: 2, kind: output, shape index: {0}]   ;;  %s1424_s3 = inlined_call_operand.vmem [shape: f32[2,2,128], index: 3, kind: output, shape index: {1}]  }
   0x1 LB: > { %s900_s13 = sadd.s32 4294967295, %s1220_s12   ;;  %p904_p0 = scmp.ge.s32.totalorder %s1220_s12, 1  ;;  %s1220_s12 = sphi %s1242_s12, %s14_s12  }
   0x2   : > { %p140_p1 = scmp.lt.s32.totalorder %s1220_s12, 3 }
   0x4   : > { %p141_p2 = pnand %p904_p0, %p140_p1 }
   0x5   : > { %p168_p3 = scmp.lt.s32.totalorder (!%p141_p2), %s900_s13, 1 }
   0x6   : > { %144 = sbr.rel (%p141_p2) target bundleno = 309 (0x135), region = 28 }
   0xb   : > { %v1193_v0 = vld [vmem:[%s1422_s1 + $0x20] ss:$0 sps:$4 sm:$0xff]   ;;  %vm380_vm0 = vcmask 1043456   ;;  %v1194_v1 = vld [vmem:[%s1422_s1 + $0x18] sm:$0xff]   ;;  %v1195_v3 = vld [vmem:[%s1422_s1 + $0x10] sm:$0xff]   ;;  %s1426_s13 = smov (!%p168_p3, %s900_s13), 1 }
   0xc   : > { %1183 = vmatprep.subr.msk.bf16.mxu0 %vm380_vm0, %v1193_v0  ;;  %v382_v2 = vsel %vm380_vm0, %v1193_v0, 0  ;;  %1184 = vmatprep.subr.msk.bf16.mxu1 %vm380_vm0, %v1193_v0  ;;  %s981_s20 = sshll.u32 %s1426_s13, 7  ;;  %v1196_v4 = vld [vmem:[%s1422_s1 + $0x8] sm:$0xff]   ;;  %vm331_vm1 = vcmask 588800   ;;  %v1197_v6 = vld [vmem:[%s1422_s1] sm:$0xff]   ;;  %s909_s4 = sshll.u32 %s1426_s13, 1 }
   0xd   : > { %1132 = vmatpush3.bf16.msra.mxu0 %v382_v2  ;;  %1178 = vmatpush3.bf16.msra.mxu1 %v382_v2  ;;  %s1270_s25 = scalar_lea.vmem %s1421_s0, %s981_s20  ;;  %s1316_s30 = scalar_lea.vmem %s1423_s2, %s981_s20  ;;  %vm811_vm2 = vcmask 1040384  }
   0xe   : > { %1133 = vmatprep.subr.bf16.mxu0 %v1194_v1  ;;  %1174 = vmatprep.subr.bf16.mxu1 %v1194_v1  ;;  %v1198_v5 = vld [vmem:[%s1270_s25] sm:$0xff]   ;;  %v1199_v7 = vld [vmem:[%s1270_s25 + $0x8] sm:$0xff]   ;;  %v1200_v9 = vld [vmem:[%s1270_s25 + $0x10] sm:$0xff]   ;;  %s181_s7 = scalar_lea.vmem %s1424_s3, %s909_s4 }
   0xf   : > { %1141 = vmatprep.mubr.msk.bf16.mxu0 %vm331_vm1, %v1198_v5  ;;  %v1206_v8 = vld [vmem:[%s1270_s25 + $0x40] sm:$0xff]   ;;  %v1207_v10 = vld [vmem:[%s1270_s25 + $0x48] sm:$0xff]   ;;  %v1208_v11 = vld [vmem:[%s1270_s25 + $0x50] sm:$0xff]  }
  0x10   : > { %1157 = vmatprep.mubr.msk.bf16.mxu1 %vm331_vm1, %v1206_v8  ;;  %v1201_v12 = vld [vmem:[%s1270_s25 + $0x18] sm:$0xff]   ;;  %v1202_v13 = vld [vmem:[%s1270_s25 + $0x20] sm:$0xff]   ;;  %v1203_v16 = vld [vmem:[%s1270_s25 + $0x28] sm:$0xff]  }
  0x11   : > { %1134 = vmatpush3.bf16.msra.mxu0 %v1194_v1  ;;  %1179 = vmatpush3.bf16.msra.mxu1 %v1194_v1  ;;  %v1209_v14 = vld [vmem:[%s1270_s25 + $0x58] sm:$0xff]   ;;  %v1210_v15 = vld [vmem:[%s1270_s25 + $0x60] sm:$0xff]   ;;  %v1204_v17 = vld [vmem:[%s1270_s25 + $0x30] sm:$0xff]  }
  0x12   : > { %1135 = vmatprep.subr.bf16.mxu0 %v1195_v3  ;;  %1175 = vmatprep.subr.bf16.mxu1 %v1195_v3  ;;  %v1211_v18 = vld [vmem:[%s1270_s25 + $0x68] sm:$0xff]   ;;  %v1212_v19 = vld [vmem:[%s1270_s25 + $0x70] sm:$0xff]   ;;  %v1205_v20 = vld [vmem:[%s1270_s25 + $0x38] sm:$0xff]  }
  0x13   : > { %v1213_v21 = vld [vmem:[%s1270_s25 + $0x78] sm:$0xff]  }
  0x15   : > { %1136 = vmatpush3.bf16.msra.mxu0 %v1195_v3  ;;  %1180 = vmatpush3.bf16.msra.mxu1 %v1195_v3 }
  0x16   : > { %1137 = vmatprep.subr.bf16.mxu0 %v1196_v4  ;;  %1176 = vmatprep.subr.bf16.mxu1 %v1196_v4 }
  0x19   : > { %1138 = vmatpush3.bf16.msra.mxu0 %v1196_v4  ;;  %1181 = vmatpush3.bf16.msra.mxu1 %v1196_v4 }
  0x1a   : > { %1139 = vmatprep.subr.bf16.mxu0 %v1197_v6  ;;  %1177 = vmatprep.subr.bf16.mxu1 %v1197_v6 }
  0x1d   : > { %1140 = vmatpush3.bf16.msra.mxu0 %v1197_v6  ;;  %1182 = vmatpush3.bf16.msra.mxu1 %v1197_v6 }
  0x20   : > { %1142 = vmatmul.mubr.msk.bf16.vlgmr.msra.gmra.mxu0 %vm331_vm1, %v1199_v7  ;;  %1158 = vmatmul.mubr.msk.bf16.vlgmr.msra.gmra.mxu1 %vm331_vm1, %v1207_v10 }
  0x21   : > { %1145 = vmatprep.mubr.msk.bf16.mxu0 %vm331_vm1, %v1200_v9  ;;  %1161 = vmatprep.mubr.msk.bf16.mxu1 %vm331_vm1, %v1208_v11 }
  0x28   : > { %1146 = vmatmul.mubr.msk.bf16.gmra.mxu0 %vm331_vm1, %v1201_v12  ;;  %1162 = vmatmul.mubr.msk.bf16.gmra.mxu1 %vm331_vm1, %v1209_v14 }
  0x29   : > { %1149 = vmatprep.mubr.msk.bf16.mxu0 %vm331_vm1, %v1202_v13  ;;  %1165 = vmatprep.mubr.msk.bf16.mxu1 %vm331_vm1, %v1210_v15 }
  0x30   : > { %1150 = vmatmul.mubr.msk.bf16.gmra.mxu0 %vm331_vm1, %v1203_v16  ;;  %1166 = vmatmul.mubr.msk.bf16.gmra.mxu1 %vm331_vm1, %v1211_v18 }
  0x31   : > { %1153 = vmatprep.mubr.msk.bf16.mxu0 %vm331_vm1, %v1204_v17  ;;  %1169 = vmatprep.mubr.msk.bf16.mxu1 %vm331_vm1, %v1212_v19 }
  0x38   : > { %1154 = vmatmul.mubr.msk.bf16.gmra.mxu0 %vm331_vm1, %v1205_v20  ;;  %1170 = vmatmul.mubr.msk.bf16.gmra.mxu1 %vm331_vm1, %v1213_v21 }
  0xe0   : > { %v1143_v22 = vpop.f32.mrf.mxu0  ;;  %v1307_v23 = vpop.f32.mrf.mxu1 }
  0xe1   : > { %v744_v38 = vmul.f32 %v1143_v22, %v1143_v22 }
  0xe2   : > { %v418_v24 = vpop.f32.mrf.mxu0  ;;  %v1309_v25 = vpop.f32.mrf.mxu1 }
  0xe3   : > { %v742_v31 = vmul.f32 %v418_v24, %v418_v24 }
  0xe4   : > { %v1144_v26 = vpop.f32.mrf.mxu0  ;;  %v1318_v28 = vpop.f32.mrf.mxu1 }
  0xe5   : > { %v1023_v27 = vpack.c.bf16 %v1144_v26, %v1143_v22  ;;  %v1063_v30 = vpack.c.bf16 %v1318_v28, %v1307_v23  ;;  %v745_v43 = vmul.f32 %v1144_v26, %v1144_v26 }
  0xe6   : > { %v421_v29 = vpop.f32.mrf.mxu0  ;;  %v1323_v35 = vpop.f32.mrf.mxu1 }
  0xe7   : > { %1095 = vst [vmem:[%s1316_s30 + $0x8] sm:$0xff] %v1023_v27   ;;  %v1018_v32 = vpack.c.bf16 %v421_v29, %v418_v24  ;;  %v705_v33 = vadd.f32 %v421_v29, %v418_v24  ;;  %v743_v34 = vmul.f32 %v421_v29, %v421_v29  ;;  %1103 = vst [vmem:[%s1316_s30 + $0x48] sm:$0xff] %v1063_v30  }
  0xe8   : > { %v1147_v36 = vpop.f32.mrf.mxu0  ;;  %v1058_v37 = vpack.c.bf16 %v1323_v35, %v1309_v25  ;;  %v1329_v41 = vpop.f32.mrf.mxu1 }
  0xe9   : > { %1019 = vst [vmem:[%s1316_s30] sm:$0xff] %v1018_v32   ;;  %v706_v39 = vadd.f32 %v1143_v22, %v705_v33  ;;  %v774_v40 = vadd.f32 %v743_v34, %v742_v31  ;;  %v748_v62 = vmul.f32 %v1147_v36, %v1147_v36 }
  0xea   : > { %v434_v42 = vpop.f32.mrf.mxu0  ;;  %1102 = vst [vmem:[%s1316_s30 + $0x40] sm:$0xff] %v1058_v37   ;;  %v1332_v46 = vpop.f32.mrf.mxu1 }
  0xeb   : > { %v775_v44 = vadd.f32 %v774_v40, %v744_v38  ;;  %v707_v45 = vadd.f32 %v1144_v26, %v706_v39  ;;  %v746_v49 = vmul.f32 %v434_v42, %v434_v42 }
  0xec   : > { %v1148_v47 = vpop.f32.mrf.mxu0  ;;  %v1334_v52 = vpop.f32.mrf.mxu1 }
  0xed   : > { %v708_v48 = vadd.f32 %v707_v45, %v434_v42  ;;  %v776_v50 = vadd.f32 %v775_v44, %v745_v43  ;;  %v1033_v51 = vpack.c.bf16 %v1148_v47, %v1147_v36  ;;  %v1073_v54 = vpack.c.bf16 %v1334_v52, %v1329_v41 }
  0xee   : > { %v437_v53 = vpop.f32.mrf.mxu0  ;;  %v1339_v59 = vpop.f32.mrf.mxu1  ;;  %v749_v3 = vmul.f32 %v1148_v47, %v1148_v47 }
  0xef   : > { %v777_v55 = vadd.f32 %v776_v50, %v746_v49  ;;  %1097 = vst [vmem:[%s1316_s30 + $0x18] sm:$0xff] %v1033_v51   ;;  %v1028_v56 = vpack.c.bf16 %v437_v53, %v434_v42  ;;  %v709_v57 = vadd.f32 %v708_v48, %v437_v53  ;;  %v747_v58 = vmul.f32 %v437_v53, %v437_v53 }
  0xf0   : > { %v1151_v60 = vpop.f32.mrf.mxu0  ;;  %1105 = vst [vmem:[%s1316_s30 + $0x58] sm:$0xff] %v1073_v54   ;;  %v1068_v61 = vpack.c.bf16 %v1339_v59, %v1332_v46  ;;  %v1345_v1 = vpop.f32.mrf.mxu1 }
  0xf1   : > { %1096 = vst [vmem:[%s1316_s30 + $0x10] sm:$0xff] %v1028_v56   ;;  %v710_v63 = vadd.f32 %v1147_v36, %v709_v57  ;;  %v778_v0 = vadd.f32 %v777_v55, %v747_v58  ;;  %v752_v22 = vmul.f32 %v1151_v60, %v1151_v60  ;;  %v758_v58 = vmul.f32 %v1309_v25, %v1309_v25 }
  0xf2   : > { %v450_v2 = vpop.f32.mrf.mxu0  ;;  %1104 = vst [vmem:[%s1316_s30 + $0x50] sm:$0xff] %v1068_v61   ;;  %v1348_v6 = vpop.f32.mrf.mxu1 }
  0xf3   : > { %v779_v4 = vadd.f32 %v778_v0, %v748_v62  ;;  %v711_v5 = vadd.f32 %v1148_v47, %v710_v63  ;;  %v750_v9 = vmul.f32 %v450_v2, %v450_v2  ;;  %v759_v63 = vmul.f32 %v1323_v35, %v1323_v35 }
  0xf4   : > { %v1152_v7 = vpop.f32.mrf.mxu0  ;;  %v1350_v12 = vpop.f32.mrf.mxu1 }
  0xf5   : > { %v712_v8 = vadd.f32 %v711_v5, %v450_v2  ;;  %v780_v10 = vadd.f32 %v779_v4, %v749_v3  ;;  %v1043_v11 = vpack.c.bf16 %v1152_v7, %v1151_v60  ;;  %v1083_v14 = vpack.c.bf16 %v1350_v12, %v1345_v1 }
  0xf6   : > { %v453_v13 = vpop.f32.mrf.mxu0  ;;  %v1355_v19 = vpop.f32.mrf.mxu1  ;;  %v753_v30 = vmul.f32 %v1152_v7, %v1152_v7  ;;  %v761_v5 = vmul.f32 %v1318_v28, %v1318_v28 }
  0xf7   : > { %v781_v15 = vadd.f32 %v780_v10, %v750_v9  ;;  %1099 = vst [vmem:[%s1316_s30 + $0x28] sm:$0xff] %v1043_v11   ;;  %v1038_v16 = vpack.c.bf16 %v453_v13, %v450_v2  ;;  %v713_v17 = vadd.f32 %v712_v8, %v453_v13  ;;  %v751_v18 = vmul.f32 %v453_v13, %v453_v13 }
  0xf8   : > { %v1155_v20 = vpop.f32.mrf.mxu0  ;;  %1107 = vst [vmem:[%s1316_s30 + $0x68] sm:$0xff] %v1083_v14   ;;  %v1078_v21 = vpack.c.bf16 %v1355_v19, %v1348_v6  ;;  %v1361_v27 = vpop.f32.mrf.mxu1  ;;  %v760_v2 = vmul.f32 %v1307_v23, %v1307_v23  ;;  %v762_v9 = vmul.f32 %v1332_v46, %v1332_v46  ;;  %v763_v13 = vmul.f32 %v1339_v59, %v1339_v59 }
  0xf9   : > { %1098 = vst [vmem:[%s1316_s30 + $0x20] sm:$0xff] %v1038_v16   ;;  %v714_v24 = vadd.f32 %v1151_v60, %v713_v17  ;;  %v782_v26 = vadd.f32 %v781_v15, %v751_v18  ;;  %v756_v51 = vmul.f32 %v1155_v20, %v1155_v20  ;;  %v766_v18 = vmul.f32 %v1348_v6, %v1348_v6 }
  0xfa   : > { %v466_v29 = vpop.f32.mrf.mxu0  ;;  %1106 = vst [vmem:[%s1316_s30 + $0x60] sm:$0xff] %v1078_v21   ;;  %v530_v33 = vpop.f32.mrf.mxu1 }
  0xfb   : > { %v783_v31 = vadd.f32 %v782_v26, %v752_v22  ;;  %v715_v32 = vadd.f32 %v1152_v7, %v714_v24  ;;  %v754_v37 = vmul.f32 %v466_v29, %v466_v29  ;;  %v767_v22 = vmul.f32 %v1355_v19, %v1355_v19 }
  0xfc   : > { %v1156_v34 = vpop.f32.mrf.mxu0  ;;  %v1364_v40 = vpop.f32.mrf.mxu1 }
  0xfd   : > { %v716_v36 = vadd.f32 %v715_v32, %v466_v29  ;;  %v784_v38 = vadd.f32 %v783_v31, %v753_v30  ;;  %v1053_v39 = vpack.c.bf16 %v1156_v34, %v1155_v20  ;;  %v1093_v43 = vpack.c.bf16 %v1364_v40, %v1361_v27 }
  0xfe   : > { %v469_v42 = vpop.f32.mrf.mxu0  ;;  %v533_v49 = vpop.f32.mrf.mxu1  ;;  %v757_v55 = vmul.f32 %v1156_v34, %v1156_v34  ;;  %v770_v31 = vmul.f32 %v530_v33, %v530_v33 }
  0xff   : > { %v785_v44 = vadd.f32 %v784_v38, %v754_v37  ;;  %1101 = vst [vmem:[%s1316_s30 + $0x38] sm:$0xff] %v1053_v39   ;;  %v1048_v45 = vpack.c.bf16 %v469_v42, %v466_v29  ;;  %v717_v47 = vadd.f32 %v716_v36, %v469_v42  ;;  %v755_v48 = vmul.f32 %v469_v42, %v469_v42 }
 0x100   : > { %1109 = vst [vmem:[%s1316_s30 + $0x78] sm:$0xff] %v1093_v43   ;;  %v1088_v50 = vpack.c.bf16 %v533_v49, %v530_v33  ;;  %v771_v37 = vmul.f32 %v533_v49, %v533_v49  ;;  %v773_v39 = vmul.f32 %v1364_v40, %v1364_v40 }
 0x101   : > { %1100 = vst [vmem:[%s1316_s30 + $0x30] sm:$0xff] %v1048_v45   ;;  %v718_v53 = vadd.f32 %v1155_v20, %v717_v47  ;;  %v786_v54 = vadd.f32 %v785_v44, %v755_v48 }
 0x102   : > { %1108 = vst [vmem:[%s1316_s30 + $0x70] sm:$0xff] %v1088_v50  }
 0x103   : > { %v719_v56 = vadd.f32 %v1156_v34, %v718_v53  ;;  %v787_v57 = vadd.f32 %v786_v54, %v756_v51 }
 0x105   : > { %v788_v60 = vadd.f32 %v787_v57, %v757_v55  ;;  %v720_v61 = vadd.f32 %v719_v56, %v1309_v25 }
 0x107   : > { %v721_v62 = vadd.f32 %v720_v61, %v1323_v35  ;;  %v789_v0 = vadd.f32 %v788_v60, %v758_v58 }
 0x109   : > { %v722_v3 = vadd.f32 %v1307_v23, %v721_v62  ;;  %v790_v4 = vadd.f32 %v789_v0, %v759_v63  ;;  %v764_v23 = vmul.f32 %v1329_v41, %v1329_v41 }
 0x10b   : > { %v791_v7 = vadd.f32 %v790_v4, %v760_v2  ;;  %v723_v8 = vadd.f32 %v1318_v28, %v722_v3  ;;  %v765_v28 = vmul.f32 %v1334_v52, %v1334_v52 }
 0x10d   : > { %v724_v25 = vadd.f32 %v723_v8, %v1332_v46  ;;  %v792_v10 = vadd.f32 %v791_v7, %v761_v5 }
 0x10f   : > { %v793_v35 = vadd.f32 %v792_v10, %v762_v9  ;;  %v725_v11 = vadd.f32 %v724_v25, %v1339_v59 }
 0x111   : > { %v726_v14 = vadd.f32 %v1329_v41, %v725_v11  ;;  %v794_v15 = vadd.f32 %v793_v35, %v763_v13  ;;  %v768_v41 = vmul.f32 %v1345_v1, %v1345_v1 }
 0x113   : > { %v795_v16 = vadd.f32 %v794_v15, %v764_v23  ;;  %v727_v17 = vadd.f32 %v1334_v52, %v726_v14  ;;  %v769_v52 = vmul.f32 %v1350_v12, %v1350_v12 }
 0x115   : > { %v728_v46 = vadd.f32 %v727_v17, %v1348_v6  ;;  %v796_v20 = vadd.f32 %v795_v16, %v765_v28 }
 0x117   : > { %v797_v21 = vadd.f32 %v796_v20, %v766_v18  ;;  %v729_v59 = vadd.f32 %v728_v46, %v1355_v19  ;;  %v772_v19 = vmul.f32 %v1361_v27, %v1361_v27 }
 0x119   : > { %v730_v24 = vadd.f32 %v1345_v1, %v729_v59  ;;  %v798_v26 = vadd.f32 %v797_v21, %v767_v22 }
 0x11b   : > { %v799_v29 = vadd.f32 %v798_v26, %v768_v41  ;;  %v731_v30 = vadd.f32 %v1350_v12, %v730_v24 }
 0x11d   : > { %v732_v6 = vadd.f32 %v731_v30, %v530_v33  ;;  %v800_v32 = vadd.f32 %v799_v29, %v769_v52 }
 0x11f   : > { %v801_v34 = vadd.f32 %v800_v32, %v770_v31  ;;  %v733_v36 = vadd.f32 %v732_v6, %v533_v49 }
 0x121   : > { %v734_v38 = vadd.f32 %v1361_v27, %v733_v36  ;;  %v802_v1 = vadd.f32 %v801_v34, %v771_v37 }
 0x123   : > { %v735_v42 = vadd.f32 %v1364_v40, %v734_v38  ;;  %v803_v43 = vadd.f32 %v802_v1, %v772_v19 }
 0x125   : > { %v736_v12 = vrot.slane %v735_v42, 4  ;;  %v804_v44 = vadd.f32 %v803_v43, %v773_v39 }
 0x127   : > { %v737_v33 = vadd.f32 %v736_v12, %v735_v42  ;;  %v805_v45 = vrot.slane %v804_v44, 4 }
 0x129   : > { %v738_v47 = vrot.slane %v737_v33, 2  ;;  %v806_v48 = vadd.f32 %v805_v45, %v804_v44 }
 0x12b   : > { %v739_v49 = vadd.f32 %v738_v47, %v737_v33  ;;  %v807_v50 = vrot.slane %v806_v48, 2 }
 0x12d   : > { %v740_v51 = vrot.slane %v739_v49, 1  ;;  %v808_v53 = vadd.f32 %v807_v50, %v806_v48 }
 0x12f   : > { %v809_v54 = vrot.slane %v808_v53, 1  ;;  %v741_v27 = vadd.f32 %v740_v51, %v739_v49 }
 0x131   : > { %v810_v40 = vadd.f32 %v809_v54, %v808_v53 }
 0x133   : > { %v812_v55 = vsel %vm811_vm2, %v741_v27, %v810_v40 }
 0x134   : > { %813 = vst [vmem:[%s181_s7] sm:$0x3] %v812_v55 }
 0x135 PF: > { %s14_s12 = sadd.s32 1, %s1220_s12  }
 0x136   : > { %p11_p4 = scmp.ge.s32.totalorder %s14_s12, 4  }
 0x138   :  { %13 = sbr.rel (!%p11_p4) target bundleno = 1 (0x1), region = 70 }

</bundles_post_ra>
